<compile_context>
chip_gen: v7x
topology: tpu7x:2x2x1
jax: 0.10.0
libtpu: 0.0.40
codegen_flags: <defaults>
</compile_context>

<pallas_src>
import functools

import jax
import jax.numpy as jnp
from jax import lax
from jax.experimental import pallas as pl
from jax.experimental.pallas import tpu as pltpu

# ---------------- model hyper-params (small, consistent with the module) ----------------
VOCAB_SIZE = 50
EMBEDDING_DIM = 32
HIDDEN_DIM = 32
N_LAYERS = 2
OUTPUT_SIZE = 1
BATCH = 4
SEQ_LEN = 8


# ---------------- fused recurrence kernel ------------------------------------------------
def fused_lstm_kernel(gih0_ref,                # (T, B, 4H) precomputed layer-0 input proj (+biases)
                      whh0_ref,                # (H, 4H) layer-0 recurrent weight (transposed)
                      wih1_ref, whh1_ref,      # (H, 4H) layer-1 input / recurrent weights
                      b1_ref,                  # (1, 4H) layer-1 bias (b_ih + b_hh)
                      fcw_ref, fcb_ref,        # (1, H), (1, 1)
                      h0_ref, c0_ref,          # (L, B, H) initial state
                      out_ref,                 # (B, 1) sigmoid(fc(h_last))
                      state_ref,               # (B, 4H) lane-dense [h_l0 | h_l1 | c_l0 | c_l1]
                      *, B, T, H):
    # weights / hoisted bias broadcast loaded once, live for the whole unrolled loop
    whh0 = whh0_ref[...]
    wih1 = wih1_ref[...]
    whh1 = whh1_ref[...]
    b1 = jnp.broadcast_to(b1_ref[...], (B, 4 * H))   # hoisted: traced once, not per step

    def gates_to_hc(g, c):
        # exact sigmoid / tanh applied to the FULL (B, 4H) gates vreg, sliced afterwards
        s = 1.0 / (1.0 + jnp.exp(-g))
        u = jnp.tanh(g)
        i_g = s[:, 0 * H:1 * H]                       # PyTorch gate order [i, f, g, o]
        f_g = s[:, 1 * H:2 * H]
        o_g = s[:, 3 * H:4 * H]
        g_g = u[:, 2 * H:3 * H]
        c_new = f_g * c + i_g * g_g
        h_new = o_g * jnp.tanh(c_new)
        return h_new, c_new

    def body(t, carry):
        h0, c0, h1, c1 = carry
        # layer 0: input projection precomputed -> only the recurrent matmul on the chain
        g0 = gih0_ref[t] + jnp.dot(h0, whh0, preferred_element_type=jnp.float32)
        h0, c0 = gates_to_hc(g0, c0)
        # layer 1: two tiny MXU pushes, no lane concat of [h0, h1]
        g1 = (jnp.dot(h0, wih1, preferred_element_type=jnp.float32)
              + jnp.dot(h1, whh1, preferred_element_type=jnp.float32)
              + b1)
        h1, c1 = gates_to_hc(g1, c1)
        return h0, c0, h1, c1

    init = (h0_ref[0], c0_ref[0], h0_ref[1], c0_ref[1])
    h0, c0, h1, c1 = lax.fori_loop(0, T, body, init, unroll=True)

    # TODO(synk): nn.Dropout(p=0.5) is identity in eval mode; no dropout applied here.
    # FC(H -> 1) + sigmoid for the LAST timestep only (VPU multiply + lane reduce).
    logit = jnp.sum(h1 * fcw_ref[...], axis=-1, keepdims=True) + fcb_ref[...]   # (B, 1)
    # approximate EUP reciprocal only here (non-recurrent), error does not compound
    out_ref[...] = pl.reciprocal(1.0 + jnp.exp(-logit), approx=True)

    # lane-dense epilogue store: one unmasked (B, 4H) = (4, 128) slab
    state_ref[...] = jnp.concatenate([h0, h1, c0, c1], axis=-1)


# ---------------- SentimentNet forward ----------------------------------------------------
def sentiment_forward(params, x_tokens, hidden):
    """x_tokens: (B, T) int token ids; hidden = (h0, c0) each (n_layers, B, H)."""
    assert N_LAYERS == 2
    h_init, c_init = hidden
    B, T = x_tokens.shape
    E, H = EMBEDDING_DIM, HIDDEN_DIM

    # hoisted embedding gather (B,T,E ~ 4 KB) -> (T, B, E)
    x_emb = jnp.take(params["embedding"].astype(jnp.float32), x_tokens, axis=0)   # (B, T, E)
    x_tbe = jnp.transpose(x_emb, (1, 0, 2))                                        # (T, B, E)

    # layer-0 input projection for ALL timesteps, with both layer-0 biases folded in
    w_ih0 = params["w_ih_l0"].astype(jnp.float32)                                  # (4H, E)
    b0 = (params["b_ih_l0"] + params["b_hh_l0"]).astype(jnp.float32)               # (4H,)
    gih0 = jnp.einsum("tbe,ge->tbg", x_tbe, w_ih0) + b0                            # (T, B, 4H)

    # recurrent / layer-1 weights pre-transposed to (in, 4H)
    w_hh0 = params["w_hh_l0"].T.astype(jnp.float32)                                # (H, 4H)
    w_ih1 = params["w_ih_l1"].T.astype(jnp.float32)                                # (H, 4H)
    w_hh1 = params["w_hh_l1"].T.astype(jnp.float32)                                # (H, 4H)
    b1 = (params["b_ih_l1"] + params["b_hh_l1"]).reshape(1, 4 * H).astype(jnp.float32)
    fcw = params["fc_w"].reshape(1, H).astype(jnp.float32)                         # OUTPUT_SIZE == 1
    fcb = params["fc_b"].reshape(1, 1).astype(jnp.float32)

    kernel = functools.partial(fused_lstm_kernel, B=B, T=T, H=H)
    out_b1, state = pl.pallas_call(
        kernel,
        out_shape=(jax.ShapeDtypeStruct((B, 1), jnp.float32),
                   jax.ShapeDtypeStruct((B, 4 * H), jnp.float32)),
        grid=(1,),
        in_specs=[
            pl.BlockSpec((T, B, 4 * H), lambda i: (0, 0, 0)),          # gih0
            pl.BlockSpec((H, 4 * H), lambda i: (0, 0)),                # w_hh0
            pl.BlockSpec((H, 4 * H), lambda i: (0, 0)),                # w_ih1
            pl.BlockSpec((H, 4 * H), lambda i: (0, 0)),                # w_hh1
            pl.BlockSpec((1, 4 * H), lambda i: (0, 0)),                # b1
            pl.BlockSpec((1, H), lambda i: (0, 0)),                    # fc_w
            pl.BlockSpec((1, 1), lambda i: (0, 0)),                    # fc_b
            pl.BlockSpec((N_LAYERS, B, H), lambda i: (0, 0, 0)),       # h0
            pl.BlockSpec((N_LAYERS, B, H), lambda i: (0, 0, 0)),       # c0
        ],
        out_specs=(pl.BlockSpec((B, 1), lambda i: (0, 0)),
                   pl.BlockSpec((B, 4 * H), lambda i: (0, 0))),
        compiler_params=pltpu.CompilerParams(dimension_semantics=("arbitrary",)),
    )(gih0, w_hh0, w_ih1, w_hh1, b1, fcw, fcb,
      h_init.astype(jnp.float32), c_init.astype(jnp.float32))

    out = out_b1[:, 0]                                                 # (B,) == out.view(B,T)[:, -1]
    h_n = jnp.stack([state[:, 0 * H:1 * H], state[:, 1 * H:2 * H]], axis=0)
    c_n = jnp.stack([state[:, 2 * H:3 * H], state[:, 3 * H:4 * H]], axis=0)
    return out, (h_n, c_n)


# ---------------- pure-JAX reference (numerical sanity check) -----------------------------
def sentiment_forward_ref(params, x_tokens, hidden):
    h_all, c_all = hidden
    B, T = x_tokens.shape
    H = HIDDEN_DIM
    embeds = jnp.take(params["embedding"], x_tokens, axis=0)           # (B, T, E)

    def cell(x, h, c, w_ih, w_hh, b_ih, b_hh):
        gates = x @ w_ih.T + h @ w_hh.T + b_ih + b_hh
        i = jax.nn.sigmoid(gates[:, 0 * H:1 * H])
        f = jax.nn.sigmoid(gates[:, 1 * H:2 * H])
        g = jnp.tanh(gates[:, 2 * H:3 * H])
        o = jax.nn.sigmoid(gates[:, 3 * H:4 * H])
        c_new = f * c + i * g
        h_new = o * jnp.tanh(c_new)
        return h_new, c_new

    h = [h_all[l] for l in range(N_LAYERS)]
    c = [c_all[l] for l in range(N_LAYERS)]
    outs = []
    for t in range(T):
        x = embeds[:, t, :]
        for l in range(N_LAYERS):
            h[l], c[l] = cell(x, h[l], c[l],
                              params[f"w_ih_l{l}"], params[f"w_hh_l{l}"],
                              params[f"b_ih_l{l}"], params[f"b_hh_l{l}"])
            x = h[l]
        outs.append(x)
    lstm_out = jnp.stack(outs, axis=1).reshape(-1, H)                  # (B*T, H)
    out = jax.nn.sigmoid(lstm_out @ params["fc_w"].T + params["fc_b"])
    out = out.reshape(B, -1)[:, -1]
    return out, (jnp.stack(h), jnp.stack(c))


# ---------------- deterministic parameter init (PyTorch-style shapes) ---------------------
def init_params(key):
    params = {}
    k = 1.0 / jnp.sqrt(HIDDEN_DIM)
    keys = jax.random.split(key, 4 * N_LAYERS + 3)
    ki = 0

    # nn.Embedding(vocab_size, embedding_dim): N(0, 1)
    params["embedding"] = jax.random.normal(
        keys[ki], (VOCAB_SIZE, EMBEDDING_DIM), jnp.float32); ki += 1

    for layer in range(N_LAYERS):
        in_dim = EMBEDDING_DIM if layer == 0 else HIDDEN_DIM
        params[f"w_ih_l{layer}"] = jax.random.uniform(
            keys[ki], (4 * HIDDEN_DIM, in_dim), jnp.float32, -k, k); ki += 1
        params[f"w_hh_l{layer}"] = jax.random.uniform(
            keys[ki], (4 * HIDDEN_DIM, HIDDEN_DIM), jnp.float32, -k, k); ki += 1
        params[f"b_ih_l{layer}"] = jax.random.uniform(
            keys[ki], (4 * HIDDEN_DIM,), jnp.float32, -k, k); ki += 1
        params[f"b_hh_l{layer}"] = jax.random.uniform(
            keys[ki], (4 * HIDDEN_DIM,), jnp.float32, -k, k); ki += 1

    # nn.Linear(hidden_dim, output_size)
    params["fc_w"] = jax.random.uniform(
        keys[ki], (OUTPUT_SIZE, HIDDEN_DIM), jnp.float32, -k, k); ki += 1
    params["fc_b"] = jax.random.uniform(
        keys[ki], (OUTPUT_SIZE,), jnp.float32, -k, k); ki += 1
    return params


if __name__ == "__main__":
    key = jax.random.PRNGKey(0)
    pkey, xkey = jax.random.split(key)

    params = init_params(pkey)

    # integer token ids, (B, T)
    x_tokens = jax.random.randint(xkey, (BATCH, SEQ_LEN), 0, VOCAB_SIZE, dtype=jnp.int32)

    # init_hidden: zeros (n_layers, B, H)
    h0 = jnp.zeros((N_LAYERS, BATCH, HIDDEN_DIM), jnp.float32)
    c0 = jnp.zeros((N_LAYERS, BATCH, HIDDEN_DIM), jnp.float32)

    out, (h_n, c_n) = jax.jit(sentiment_forward)(params, x_tokens, (h0, c0))
    jax.block_until_ready((out, h_n, c_n))

    assert out.shape == (BATCH,)
    assert h_n.shape == (N_LAYERS, BATCH, HIDDEN_DIM)
    assert c_n.shape == (N_LAYERS, BATCH, HIDDEN_DIM)

    # numerical sanity check against the pure-JAX reference
    # (gates use exact sigmoid now; only the final output sigmoid uses the approx reciprocal)
    ref_out, (ref_h, ref_c) = jax.jit(sentiment_forward_ref)(params, x_tokens, (h0, c0))
    assert jnp.allclose(out, ref_out, atol=5e-3), float(jnp.max(jnp.abs(out - ref_out)))
    assert jnp.allclose(h_n, ref_h, atol=1e-3), float(jnp.max(jnp.abs(h_n - ref_h)))
    assert jnp.allclose(c_n, ref_c, atol=1e-3), float(jnp.max(jnp.abs(c_n - ref_c)))

    print("KERNEL_OK")
</pallas_src>

<mosaic_0001>
module attributes {stable_mosaic.version = 11 : i64} {
  func.func @fused_lstm_kernel(%arg0: i32, %arg1: memref<8x4x128xf32, #tpu.memory_space<vmem>>, %arg2: memref<32x128xf32, #tpu.memory_space<vmem>>, %arg3: memref<32x128xf32, #tpu.memory_space<vmem>>, %arg4: memref<32x128xf32, #tpu.memory_space<vmem>>, %arg5: memref<1x128xf32, #tpu.memory_space<vmem>>, %arg6: memref<1x32xf32, #tpu.memory_space<vmem>>, %arg7: memref<1x1xf32, #tpu.memory_space<vmem>>, %arg8: memref<2x4x32xf32, #tpu.memory_space<vmem>>, %arg9: memref<2x4x32xf32, #tpu.memory_space<vmem>>, %arg10: memref<4x1xf32, #tpu.memory_space<vmem>>, %arg11: memref<4x128xf32, #tpu.memory_space<vmem>>) attributes {dimension_semantics = [#tpu.dimension_semantics<arbitrary>], iteration_bounds = array<i64: 1>, scalar_prefetch = 0 : i64, scratch_operands = 0 : i64, tpu.core_type = #tpu.core_type<tc>, window_params = [{pipeline_mode = #tpu.pipeline_mode<synchronous>, transform_indices = @transform_0, window_bounds = array<i64: 8, 4, 128>}, {pipeline_mode = #tpu.pipeline_mode<synchronous>, transform_indices = @transform_1, window_bounds = array<i64: 32, 128>}, {pipeline_mode = #tpu.pipeline_mode<synchronous>, transform_indices = @transform_2, window_bounds = array<i64: 32, 128>}, {pipeline_mode = #tpu.pipeline_mode<synchronous>, transform_indices = @transform_3, window_bounds = array<i64: 32, 128>}, {pipeline_mode = #tpu.pipeline_mode<synchronous>, transform_indices = @transform_4, window_bounds = array<i64: 1, 128>}, {pipeline_mode = #tpu.pipeline_mode<synchronous>, transform_indices = @transform_5, window_bounds = array<i64: 1, 32>}, {pipeline_mode = #tpu.pipeline_mode<synchronous>, transform_indices = @transform_6, window_bounds = array<i64: 1, 1>}, {pipeline_mode = #tpu.pipeline_mode<synchronous>, transform_indices = @transform_7, window_bounds = array<i64: 2, 4, 32>}, {pipeline_mode = #tpu.pipeline_mode<synchronous>, transform_indices = @transform_8, window_bounds = array<i64: 2, 4, 32>}, {pipeline_mode = #tpu.pipeline_mode<synchronous>, transform_indices = @transform_9, window_bounds = array<i64: 4, 1>}, {pipeline_mode = #tpu.pipeline_mode<synchronous>, transform_indices = @transform_10, window_bounds = array<i64: 4, 128>}]} {
    %c0 = arith.constant 0 : index
    %c0_0 = arith.constant 0 : index
    %0 = vector.load %arg2[%c0, %c0_0] : memref<32x128xf32, #tpu.memory_space<vmem>>, vector<32x128xf32>
    %c0_1 = arith.constant 0 : index
    %c0_2 = arith.constant 0 : index
    %1 = vector.load %arg3[%c0_1, %c0_2] : memref<32x128xf32, #tpu.memory_space<vmem>>, vector<32x128xf32>
    %c0_3 = arith.constant 0 : index
    %c0_4 = arith.constant 0 : index
    %2 = vector.load %arg4[%c0_3, %c0_4] : memref<32x128xf32, #tpu.memory_space<vmem>>, vector<32x128xf32>
    %c0_5 = arith.constant 0 : index
    %c0_6 = arith.constant 0 : index
    %3 = vector.load %arg5[%c0_5, %c0_6] : memref<1x128xf32, #tpu.memory_space<vmem>>, vector<1x128xf32>
    %4 = vector.shape_cast %3 : vector<1x128xf32> to vector<1x128xf32>
    %5 = vector.broadcast %4 : vector<1x128xf32> to vector<4x128xf32>
    %c0_7 = arith.constant 0 : index
    %c0_8 = arith.constant 0 : index
    %c0_9 = arith.constant 0 : index
    %6 = vector.load %arg8[%c0_7, %c0_8, %c0_9] : memref<2x4x32xf32, #tpu.memory_space<vmem>>, vector<1x4x32xf32>
    %7 = vector.shape_cast %6 : vector<1x4x32xf32> to vector<4x32xf32>
    %c0_10 = arith.constant 0 : index
    %c0_11 = arith.constant 0 : index
    %c0_12 = arith.constant 0 : index
    %8 = vector.load %arg9[%c0_10, %c0_11, %c0_12] : memref<2x4x32xf32, #tpu.memory_space<vmem>>, vector<1x4x32xf32>
    %9 = vector.shape_cast %8 : vector<1x4x32xf32> to vector<4x32xf32>
    %c1 = arith.constant 1 : index
    %c0_13 = arith.constant 0 : index
    %c0_14 = arith.constant 0 : index
    %10 = vector.load %arg8[%c1, %c0_13, %c0_14] : memref<2x4x32xf32, #tpu.memory_space<vmem>>, vector<1x4x32xf32>
    %11 = vector.shape_cast %10 : vector<1x4x32xf32> to vector<4x32xf32>
    %c1_15 = arith.constant 1 : index
    %c0_16 = arith.constant 0 : index
    %c0_17 = arith.constant 0 : index
    %12 = vector.load %arg9[%c1_15, %c0_16, %c0_17] : memref<2x4x32xf32, #tpu.memory_space<vmem>>, vector<1x4x32xf32>
    %13 = vector.shape_cast %12 : vector<1x4x32xf32> to vector<4x32xf32>
    %c0_i32 = arith.constant 0 : i32
    %14 = arith.index_cast %c0_i32 : i32 to index
    %c0_18 = arith.constant 0 : index
    %c0_19 = arith.constant 0 : index
    %15 = vector.load %arg1[%14, %c0_18, %c0_19] : memref<8x4x128xf32, #tpu.memory_space<vmem>>, vector<1x4x128xf32>
    %16 = vector.shape_cast %15 : vector<1x4x128xf32> to vector<4x128xf32>
    %cst = arith.constant dense<0.000000e+00> : vector<4x128xf32>
    %17 = tpu.matmul %7, %0, %cst {dimension_numbers = #tpu.dot_dimension_numbers<[1], [0], [0], [1], [0, 0, 1, 1], [], []>} : vector<4x32xf32>, vector<32x128xf32>, vector<4x128xf32> -> vector<4x128xf32>
    %18 = arith.addf %16, %17 : vector<4x128xf32>
    %cst_20 = arith.constant 0.000000e+00 : f32
    %19 = vector.broadcast %cst_20 : f32 to vector<4x128xf32>
    %20 = arith.subf %19, %18 : vector<4x128xf32>
    %21 = math.exp %20 : vector<4x128xf32>
    %cst_21 = arith.constant 1.000000e+00 : f32
    %22 = vector.broadcast %cst_21 : f32 to vector<4x128xf32>
    %23 = arith.addf %22, %21 : vector<4x128xf32>
    %cst_22 = arith.constant 1.000000e+00 : f32
    %24 = vector.broadcast %cst_22 : f32 to vector<4x128xf32>
    %25 = arith.divf %24, %23 : vector<4x128xf32>
    %26 = math.tanh %18 : vector<4x128xf32>
    %27 = vector.extract_strided_slice %25 {offsets = [0, 0], sizes = [4, 32], strides = [1, 1]} : vector<4x128xf32> to vector<4x32xf32>
    %28 = vector.extract_strided_slice %25 {offsets = [0, 32], sizes = [4, 32], strides = [1, 1]} : vector<4x128xf32> to vector<4x32xf32>
    %29 = vector.extract_strided_slice %25 {offsets = [0, 96], sizes = [4, 32], strides = [1, 1]} : vector<4x128xf32> to vector<4x32xf32>
    %30 = vector.extract_strided_slice %26 {offsets = [0, 64], sizes = [4, 32], strides = [1, 1]} : vector<4x128xf32> to vector<4x32xf32>
    %31 = arith.mulf %28, %9 : vector<4x32xf32>
    %32 = arith.mulf %27, %30 : vector<4x32xf32>
    %33 = arith.addf %31, %32 : vector<4x32xf32>
    %34 = math.tanh %33 : vector<4x32xf32>
    %35 = arith.mulf %29, %34 : vector<4x32xf32>
    %cst_23 = arith.constant dense<0.000000e+00> : vector<4x128xf32>
    %36 = tpu.matmul %35, %1, %cst_23 {dimension_numbers = #tpu.dot_dimension_numbers<[1], [0], [0], [1], [0, 0, 1, 1], [], []>} : vector<4x32xf32>, vector<32x128xf32>, vector<4x128xf32> -> vector<4x128xf32>
    %cst_24 = arith.constant dense<0.000000e+00> : vector<4x128xf32>
    %37 = tpu.matmul %11, %2, %cst_24 {dimension_numbers = #tpu.dot_dimension_numbers<[1], [0], [0], [1], [0, 0, 1, 1], [], []>} : vector<4x32xf32>, vector<32x128xf32>, vector<4x128xf32> -> vector<4x128xf32>
    %38 = arith.addf %36, %37 : vector<4x128xf32>
    %39 = arith.addf %38, %5 : vector<4x128xf32>
    %cst_25 = arith.constant 0.000000e+00 : f32
    %40 = vector.broadcast %cst_25 : f32 to vector<4x128xf32>
    %41 = arith.subf %40, %39 : vector<4x128xf32>
    %42 = math.exp %41 : vector<4x128xf32>
    %cst_26 = arith.constant 1.000000e+00 : f32
    %43 = vector.broadcast %cst_26 : f32 to vector<4x128xf32>
    %44 = arith.addf %43, %42 : vector<4x128xf32>
    %cst_27 = arith.constant 1.000000e+00 : f32
    %45 = vector.broadcast %cst_27 : f32 to vector<4x128xf32>
    %46 = arith.divf %45, %44 : vector<4x128xf32>
    %47 = math.tanh %39 : vector<4x128xf32>
    %48 = vector.extract_strided_slice %46 {offsets = [0, 0], sizes = [4, 32], strides = [1, 1]} : vector<4x128xf32> to vector<4x32xf32>
    %49 = vector.extract_strided_slice %46 {offsets = [0, 32], sizes = [4, 32], strides = [1, 1]} : vector<4x128xf32> to vector<4x32xf32>
    %50 = vector.extract_strided_slice %46 {offsets = [0, 96], sizes = [4, 32], strides = [1, 1]} : vector<4x128xf32> to vector<4x32xf32>
    %51 = vector.extract_strided_slice %47 {offsets = [0, 64], sizes = [4, 32], strides = [1, 1]} : vector<4x128xf32> to vector<4x32xf32>
    %52 = arith.mulf %49, %13 : vector<4x32xf32>
    %53 = arith.mulf %48, %51 : vector<4x32xf32>
    %54 = arith.addf %52, %53 : vector<4x32xf32>
    %55 = math.tanh %54 : vector<4x32xf32>
    %56 = arith.mulf %50, %55 : vector<4x32xf32>
    %c1_i32 = arith.constant 1 : i32
    %57 = arith.index_cast %c1_i32 : i32 to index
    %c0_28 = arith.constant 0 : index
    %c0_29 = arith.constant 0 : index
    %58 = vector.load %arg1[%57, %c0_28, %c0_29] : memref<8x4x128xf32, #tpu.memory_space<vmem>>, vector<1x4x128xf32>
    %59 = vector.shape_cast %58 : vector<1x4x128xf32> to vector<4x128xf32>
    %cst_30 = arith.constant dense<0.000000e+00> : vector<4x128xf32>
    %60 = tpu.matmul %35, %0, %cst_30 {dimension_numbers = #tpu.dot_dimension_numbers<[1], [0], [0], [1], [0, 0, 1, 1], [], []>} : vector<4x32xf32>, vector<32x128xf32>, vector<4x128xf32> -> vector<4x128xf32>
    %61 = arith.addf %59, %60 : vector<4x128xf32>
    %cst_31 = arith.constant 0.000000e+00 : f32
    %62 = vector.broadcast %cst_31 : f32 to vector<4x128xf32>
    %63 = arith.subf %62, %61 : vector<4x128xf32>
    %64 = math.exp %63 : vector<4x128xf32>
    %cst_32 = arith.constant 1.000000e+00 : f32
    %65 = vector.broadcast %cst_32 : f32 to vector<4x128xf32>
    %66 = arith.addf %65, %64 : vector<4x128xf32>
    %cst_33 = arith.constant 1.000000e+00 : f32
    %67 = vector.broadcast %cst_33 : f32 to vector<4x128xf32>
    %68 = arith.divf %67, %66 : vector<4x128xf32>
    %69 = math.tanh %61 : vector<4x128xf32>
    %70 = vector.extract_strided_slice %68 {offsets = [0, 0], sizes = [4, 32], strides = [1, 1]} : vector<4x128xf32> to vector<4x32xf32>
    %71 = vector.extract_strided_slice %68 {offsets = [0, 32], sizes = [4, 32], strides = [1, 1]} : vector<4x128xf32> to vector<4x32xf32>
    %72 = vector.extract_strided_slice %68 {offsets = [0, 96], sizes = [4, 32], strides = [1, 1]} : vector<4x128xf32> to vector<4x32xf32>
    %73 = vector.extract_strided_slice %69 {offsets = [0, 64], sizes = [4, 32], strides = [1, 1]} : vector<4x128xf32> to vector<4x32xf32>
    %74 = arith.mulf %71, %33 : vector<4x32xf32>
    %75 = arith.mulf %70, %73 : vector<4x32xf32>
    %76 = arith.addf %74, %75 : vector<4x32xf32>
    %77 = math.tanh %76 : vector<4x32xf32>
    %78 = arith.mulf %72, %77 : vector<4x32xf32>
    %cst_34 = arith.constant dense<0.000000e+00> : vector<4x128xf32>
    %79 = tpu.matmul %78, %1, %cst_34 {dimension_numbers = #tpu.dot_dimension_numbers<[1], [0], [0], [1], [0, 0, 1, 1], [], []>} : vector<4x32xf32>, vector<32x128xf32>, vector<4x128xf32> -> vector<4x128xf32>
    %cst_35 = arith.constant dense<0.000000e+00> : vector<4x128xf32>
    %80 = tpu.matmul %56, %2, %cst_35 {dimension_numbers = #tpu.dot_dimension_numbers<[1], [0], [0], [1], [0, 0, 1, 1], [], []>} : vector<4x32xf32>, vector<32x128xf32>, vector<4x128xf32> -> vector<4x128xf32>
    %81 = arith.addf %79, %80 : vector<4x128xf32>
    %82 = arith.addf %81, %5 : vector<4x128xf32>
    %cst_36 = arith.constant 0.000000e+00 : f32
    %83 = vector.broadcast %cst_36 : f32 to vector<4x128xf32>
    %84 = arith.subf %83, %82 : vector<4x128xf32>
    %85 = math.exp %84 : vector<4x128xf32>
    %cst_37 = arith.constant 1.000000e+00 : f32
    %86 = vector.broadcast %cst_37 : f32 to vector<4x128xf32>
    %87 = arith.addf %86, %85 : vector<4x128xf32>
    %cst_38 = arith.constant 1.000000e+00 : f32
    %88 = vector.broadcast %cst_38 : f32 to vector<4x128xf32>
    %89 = arith.divf %88, %87 : vector<4x128xf32>
    %90 = math.tanh %82 : vector<4x128xf32>
    %91 = vector.extract_strided_slice %89 {offsets = [0, 0], sizes = [4, 32], strides = [1, 1]} : vector<4x128xf32> to vector<4x32xf32>
    %92 = vector.extract_strided_slice %89 {offsets = [0, 32], sizes = [4, 32], strides = [1, 1]} : vector<4x128xf32> to vector<4x32xf32>
    %93 = vector.extract_strided_slice %89 {offsets = [0, 96], sizes = [4, 32], strides = [1, 1]} : vector<4x128xf32> to vector<4x32xf32>
    %94 = vector.extract_strided_slice %90 {offsets = [0, 64], sizes = [4, 32], strides = [1, 1]} : vector<4x128xf32> to vector<4x32xf32>
    %95 = arith.mulf %92, %54 : vector<4x32xf32>
    %96 = arith.mulf %91, %94 : vector<4x32xf32>
    %97 = arith.addf %95, %96 : vector<4x32xf32>
    %98 = math.tanh %97 : vector<4x32xf32>
    %99 = arith.mulf %93, %98 : vector<4x32xf32>
    %c2_i32 = arith.constant 2 : i32
    %100 = arith.index_cast %c2_i32 : i32 to index
    %c0_39 = arith.constant 0 : index
    %c0_40 = arith.constant 0 : index
    %101 = vector.load %arg1[%100, %c0_39, %c0_40] : memref<8x4x128xf32, #tpu.memory_space<vmem>>, vector<1x4x128xf32>
    %102 = vector.shape_cast %101 : vector<1x4x128xf32> to vector<4x128xf32>
    %cst_41 = arith.constant dense<0.000000e+00> : vector<4x128xf32>
    %103 = tpu.matmul %78, %0, %cst_41 {dimension_numbers = #tpu.dot_dimension_numbers<[1], [0], [0], [1], [0, 0, 1, 1], [], []>} : vector<4x32xf32>, vector<32x128xf32>, vector<4x128xf32> -> vector<4x128xf32>
    %104 = arith.addf %102, %103 : vector<4x128xf32>
    %cst_42 = arith.constant 0.000000e+00 : f32
    %105 = vector.broadcast %cst_42 : f32 to vector<4x128xf32>
    %106 = arith.subf %105, %104 : vector<4x128xf32>
    %107 = math.exp %106 : vector<4x128xf32>
    %cst_43 = arith.constant 1.000000e+00 : f32
    %108 = vector.broadcast %cst_43 : f32 to vector<4x128xf32>
    %109 = arith.addf %108, %107 : vector<4x128xf32>
    %cst_44 = arith.constant 1.000000e+00 : f32
    %110 = vector.broadcast %cst_44 : f32 to vector<4x128xf32>
    %111 = arith.divf %110, %109 : vector<4x128xf32>
    %112 = math.tanh %104 : vector<4x128xf32>
    %113 = vector.extract_strided_slice %111 {offsets = [0, 0], sizes = [4, 32], strides = [1, 1]} : vector<4x128xf32> to vector<4x32xf32>
    %114 = vector.extract_strided_slice %111 {offsets = [0, 32], sizes = [4, 32], strides = [1, 1]} : vector<4x128xf32> to vector<4x32xf32>
    %115 = vector.extract_strided_slice %111 {offsets = [0, 96], sizes = [4, 32], strides = [1, 1]} : vector<4x128xf32> to vector<4x32xf32>
    %116 = vector.extract_strided_slice %112 {offsets = [0, 64], sizes = [4, 32], strides = [1, 1]} : vector<4x128xf32> to vector<4x32xf32>
    %117 = arith.mulf %114, %76 : vector<4x32xf32>
    %118 = arith.mulf %113, %116 : vector<4x32xf32>
    %119 = arith.addf %117, %118 : vector<4x32xf32>
    %120 = math.tanh %119 : vector<4x32xf32>
    %121 = arith.mulf %115, %120 : vector<4x32xf32>
    %cst_45 = arith.constant dense<0.000000e+00> : vector<4x128xf32>
    %122 = tpu.matmul %121, %1, %cst_45 {dimension_numbers = #tpu.dot_dimension_numbers<[1], [0], [0], [1], [0, 0, 1, 1], [], []>} : vector<4x32xf32>, vector<32x128xf32>, vector<4x128xf32> -> vector<4x128xf32>
    %cst_46 = arith.constant dense<0.000000e+00> : vector<4x128xf32>
    %123 = tpu.matmul %99, %2, %cst_46 {dimension_numbers = #tpu.dot_dimension_numbers<[1], [0], [0], [1], [0, 0, 1, 1], [], []>} : vector<4x32xf32>, vector<32x128xf32>, vector<4x128xf32> -> vector<4x128xf32>
    %124 = arith.addf %122, %123 : vector<4x128xf32>
    %125 = arith.addf %124, %5 : vector<4x128xf32>
    %cst_47 = arith.constant 0.000000e+00 : f32
    %126 = vector.broadcast %cst_47 : f32 to vector<4x128xf32>
    %127 = arith.subf %126, %125 : vector<4x128xf32>
    %128 = math.exp %127 : vector<4x128xf32>
    %cst_48 = arith.constant 1.000000e+00 : f32
    %129 = vector.broadcast %cst_48 : f32 to vector<4x128xf32>
    %130 = arith.addf %129, %128 : vector<4x128xf32>
    %cst_49 = arith.constant 1.000000e+00 : f32
    %131 = vector.broadcast %cst_49 : f32 to vector<4x128xf32>
    %132 = arith.divf %131, %130 : vector<4x128xf32>
    %133 = math.tanh %125 : vector<4x128xf32>
    %134 = vector.extract_strided_slice %132 {offsets = [0, 0], sizes = [4, 32], strides = [1, 1]} : vector<4x128xf32> to vector<4x32xf32>
    %135 = vector.extract_strided_slice %132 {offsets = [0, 32], sizes = [4, 32], strides = [1, 1]} : vector<4x128xf32> to vector<4x32xf32>
    %136 = vector.extract_strided_slice %132 {offsets = [0, 96], sizes = [4, 32], strides = [1, 1]} : vector<4x128xf32> to vector<4x32xf32>
    %137 = vector.extract_strided_slice %133 {offsets = [0, 64], sizes = [4, 32], strides = [1, 1]} : vector<4x128xf32> to vector<4x32xf32>
    %138 = arith.mulf %135, %97 : vector<4x32xf32>
    %139 = arith.mulf %134, %137 : vector<4x32xf32>
    %140 = arith.addf %138, %139 : vector<4x32xf32>
    %141 = math.tanh %140 : vector<4x32xf32>
    %142 = arith.mulf %136, %141 : vector<4x32xf32>
    %c3_i32 = arith.constant 3 : i32
    %143 = arith.index_cast %c3_i32 : i32 to index
    %c0_50 = arith.constant 0 : index
    %c0_51 = arith.constant 0 : index
    %144 = vector.load %arg1[%143, %c0_50, %c0_51] : memref<8x4x128xf32, #tpu.memory_space<vmem>>, vector<1x4x128xf32>
    %145 = vector.shape_cast %144 : vector<1x4x128xf32> to vector<4x128xf32>
    %cst_52 = arith.constant dense<0.000000e+00> : vector<4x128xf32>
    %146 = tpu.matmul %121, %0, %cst_52 {dimension_numbers = #tpu.dot_dimension_numbers<[1], [0], [0], [1], [0, 0, 1, 1], [], []>} : vector<4x32xf32>, vector<32x128xf32>, vector<4x128xf32> -> vector<4x128xf32>
    %147 = arith.addf %145, %146 : vector<4x128xf32>
    %cst_53 = arith.constant 0.000000e+00 : f32
    %148 = vector.broadcast %cst_53 : f32 to vector<4x128xf32>
    %149 = arith.subf %148, %147 : vector<4x128xf32>
    %150 = math.exp %149 : vector<4x128xf32>
    %cst_54 = arith.constant 1.000000e+00 : f32
    %151 = vector.broadcast %cst_54 : f32 to vector<4x128xf32>
    %152 = arith.addf %151, %150 : vector<4x128xf32>
    %cst_55 = arith.constant 1.000000e+00 : f32
    %153 = vector.broadcast %cst_55 : f32 to vector<4x128xf32>
    %154 = arith.divf %153, %152 : vector<4x128xf32>
    %155 = math.tanh %147 : vector<4x128xf32>
    %156 = vector.extract_strided_slice %154 {offsets = [0, 0], sizes = [4, 32], strides = [1, 1]} : vector<4x128xf32> to vector<4x32xf32>
    %157 = vector.extract_strided_slice %154 {offsets = [0, 32], sizes = [4, 32], strides = [1, 1]} : vector<4x128xf32> to vector<4x32xf32>
    %158 = vector.extract_strided_slice %154 {offsets = [0, 96], sizes = [4, 32], strides = [1, 1]} : vector<4x128xf32> to vector<4x32xf32>
    %159 = vector.extract_strided_slice %155 {offsets = [0, 64], sizes = [4, 32], strides = [1, 1]} : vector<4x128xf32> to vector<4x32xf32>
    %160 = arith.mulf %157, %119 : vector<4x32xf32>
    %161 = arith.mulf %156, %159 : vector<4x32xf32>
    %162 = arith.addf %160, %161 : vector<4x32xf32>
    %163 = math.tanh %162 : vector<4x32xf32>
    %164 = arith.mulf %158, %163 : vector<4x32xf32>
    %cst_56 = arith.constant dense<0.000000e+00> : vector<4x128xf32>
    %165 = tpu.matmul %164, %1, %cst_56 {dimension_numbers = #tpu.dot_dimension_numbers<[1], [0], [0], [1], [0, 0, 1, 1], [], []>} : vector<4x32xf32>, vector<32x128xf32>, vector<4x128xf32> -> vector<4x128xf32>
    %cst_57 = arith.constant dense<0.000000e+00> : vector<4x128xf32>
    %166 = tpu.matmul %142, %2, %cst_57 {dimension_numbers = #tpu.dot_dimension_numbers<[1], [0], [0], [1], [0, 0, 1, 1], [], []>} : vector<4x32xf32>, vector<32x128xf32>, vector<4x128xf32> -> vector<4x128xf32>
    %167 = arith.addf %165, %166 : vector<4x128xf32>
    %168 = arith.addf %167, %5 : vector<4x128xf32>
    %cst_58 = arith.constant 0.000000e+00 : f32
    %169 = vector.broadcast %cst_58 : f32 to vector<4x128xf32>
    %170 = arith.subf %169, %168 : vector<4x128xf32>
    %171 = math.exp %170 : vector<4x128xf32>
    %cst_59 = arith.constant 1.000000e+00 : f32
    %172 = vector.broadcast %cst_59 : f32 to vector<4x128xf32>
    %173 = arith.addf %172, %171 : vector<4x128xf32>
    %cst_60 = arith.constant 1.000000e+00 : f32
    %174 = vector.broadcast %cst_60 : f32 to vector<4x128xf32>
    %175 = arith.divf %174, %173 : vector<4x128xf32>
    %176 = math.tanh %168 : vector<4x128xf32>
    %177 = vector.extract_strided_slice %175 {offsets = [0, 0], sizes = [4, 32], strides = [1, 1]} : vector<4x128xf32> to vector<4x32xf32>
    %178 = vector.extract_strided_slice %175 {offsets = [0, 32], sizes = [4, 32], strides = [1, 1]} : vector<4x128xf32> to vector<4x32xf32>
    %179 = vector.extract_strided_slice %175 {offsets = [0, 96], sizes = [4, 32], strides = [1, 1]} : vector<4x128xf32> to vector<4x32xf32>
    %180 = vector.extract_strided_slice %176 {offsets = [0, 64], sizes = [4, 32], strides = [1, 1]} : vector<4x128xf32> to vector<4x32xf32>
    %181 = arith.mulf %178, %140 : vector<4x32xf32>
    %182 = arith.mulf %177, %180 : vector<4x32xf32>
    %183 = arith.addf %181, %182 : vector<4x32xf32>
    %184 = math.tanh %183 : vector<4x32xf32>
    %185 = arith.mulf %179, %184 : vector<4x32xf32>
    %c4_i32 = arith.constant 4 : i32
    %186 = arith.index_cast %c4_i32 : i32 to index
    %c0_61 = arith.constant 0 : index
    %c0_62 = arith.constant 0 : index
    %187 = vector.load %arg1[%186, %c0_61, %c0_62] : memref<8x4x128xf32, #tpu.memory_space<vmem>>, vector<1x4x128xf32>
    %188 = vector.shape_cast %187 : vector<1x4x128xf32> to vector<4x128xf32>
    %cst_63 = arith.constant dense<0.000000e+00> : vector<4x128xf32>
    %189 = tpu.matmul %164, %0, %cst_63 {dimension_numbers = #tpu.dot_dimension_numbers<[1], [0], [0], [1], [0, 0, 1, 1], [], []>} : vector<4x32xf32>, vector<32x128xf32>, vector<4x128xf32> -> vector<4x128xf32>
    %190 = arith.addf %188, %189 : vector<4x128xf32>
    %cst_64 = arith.constant 0.000000e+00 : f32
    %191 = vector.broadcast %cst_64 : f32 to vector<4x128xf32>
    %192 = arith.subf %191, %190 : vector<4x128xf32>
    %193 = math.exp %192 : vector<4x128xf32>
    %cst_65 = arith.constant 1.000000e+00 : f32
    %194 = vector.broadcast %cst_65 : f32 to vector<4x128xf32>
    %195 = arith.addf %194, %193 : vector<4x128xf32>
    %cst_66 = arith.constant 1.000000e+00 : f32
    %196 = vector.broadcast %cst_66 : f32 to vector<4x128xf32>
    %197 = arith.divf %196, %195 : vector<4x128xf32>
    %198 = math.tanh %190 : vector<4x128xf32>
    %199 = vector.extract_strided_slice %197 {offsets = [0, 0], sizes = [4, 32], strides = [1, 1]} : vector<4x128xf32> to vector<4x32xf32>
    %200 = vector.extract_strided_slice %197 {offsets = [0, 32], sizes = [4, 32], strides = [1, 1]} : vector<4x128xf32> to vector<4x32xf32>
    %201 = vector.extract_strided_slice %197 {offsets = [0, 96], sizes = [4, 32], strides = [1, 1]} : vector<4x128xf32> to vector<4x32xf32>
    %202 = vector.extract_strided_slice %198 {offsets = [0, 64], sizes = [4, 32], strides = [1, 1]} : vector<4x128xf32> to vector<4x32xf32>
    %203 = arith.mulf %200, %162 : vector<4x32xf32>
    %204 = arith.mulf %199, %202 : vector<4x32xf32>
    %205 = arith.addf %203, %204 : vector<4x32xf32>
    %206 = math.tanh %205 : vector<4x32xf32>
    %207 = arith.mulf %201, %206 : vector<4x32xf32>
    %cst_67 = arith.constant dense<0.000000e+00> : vector<4x128xf32>
    %208 = tpu.matmul %207, %1, %cst_67 {dimension_numbers = #tpu.dot_dimension_numbers<[1], [0], [0], [1], [0, 0, 1, 1], [], []>} : vector<4x32xf32>, vector<32x128xf32>, vector<4x128xf32> -> vector<4x128xf32>
    %cst_68 = arith.constant dense<0.000000e+00> : vector<4x128xf32>
    %209 = tpu.matmul %185, %2, %cst_68 {dimension_numbers = #tpu.dot_dimension_numbers<[1], [0], [0], [1], [0, 0, 1, 1], [], []>} : vector<4x32xf32>, vector<32x128xf32>, vector<4x128xf32> -> vector<4x128xf32>
    %210 = arith.addf %208, %209 : vector<4x128xf32>
    %211 = arith.addf %210, %5 : vector<4x128xf32>
    %cst_69 = arith.constant 0.000000e+00 : f32
    %212 = vector.broadcast %cst_69 : f32 to vector<4x128xf32>
    %213 = arith.subf %212, %211 : vector<4x128xf32>
    %214 = math.exp %213 : vector<4x128xf32>
    %cst_70 = arith.constant 1.000000e+00 : f32
    %215 = vector.broadcast %cst_70 : f32 to vector<4x128xf32>
    %216 = arith.addf %215, %214 : vector<4x128xf32>
    %cst_71 = arith.constant 1.000000e+00 : f32
    %217 = vector.broadcast %cst_71 : f32 to vector<4x128xf32>
    %218 = arith.divf %217, %216 : vector<4x128xf32>
    %219 = math.tanh %211 : vector<4x128xf32>
    %220 = vector.extract_strided_slice %218 {offsets = [0, 0], sizes = [4, 32], strides = [1, 1]} : vector<4x128xf32> to vector<4x32xf32>
    %221 = vector.extract_strided_slice %218 {offsets = [0, 32], sizes = [4, 32], strides = [1, 1]} : vector<4x128xf32> to vector<4x32xf32>
    %222 = vector.extract_strided_slice %218 {offsets = [0, 96], sizes = [4, 32], strides = [1, 1]} : vector<4x128xf32> to vector<4x32xf32>
    %223 = vector.extract_strided_slice %219 {offsets = [0, 64], sizes = [4, 32], strides = [1, 1]} : vector<4x128xf32> to vector<4x32xf32>
    %224 = arith.mulf %221, %183 : vector<4x32xf32>
    %225 = arith.mulf %220, %223 : vector<4x32xf32>
    %226 = arith.addf %224, %225 : vector<4x32xf32>
    %227 = math.tanh %226 : vector<4x32xf32>
    %228 = arith.mulf %222, %227 : vector<4x32xf32>
    %c5_i32 = arith.constant 5 : i32
    %229 = arith.index_cast %c5_i32 : i32 to index
    %c0_72 = arith.constant 0 : index
    %c0_73 = arith.constant 0 : index
    %230 = vector.load %arg1[%229, %c0_72, %c0_73] : memref<8x4x128xf32, #tpu.memory_space<vmem>>, vector<1x4x128xf32>
    %231 = vector.shape_cast %230 : vector<1x4x128xf32> to vector<4x128xf32>
    %cst_74 = arith.constant dense<0.000000e+00> : vector<4x128xf32>
    %232 = tpu.matmul %207, %0, %cst_74 {dimension_numbers = #tpu.dot_dimension_numbers<[1], [0], [0], [1], [0, 0, 1, 1], [], []>} : vector<4x32xf32>, vector<32x128xf32>, vector<4x128xf32> -> vector<4x128xf32>
    %233 = arith.addf %231, %232 : vector<4x128xf32>
    %cst_75 = arith.constant 0.000000e+00 : f32
    %234 = vector.broadcast %cst_75 : f32 to vector<4x128xf32>
    %235 = arith.subf %234, %233 : vector<4x128xf32>
    %236 = math.exp %235 : vector<4x128xf32>
    %cst_76 = arith.constant 1.000000e+00 : f32
    %237 = vector.broadcast %cst_76 : f32 to vector<4x128xf32>
    %238 = arith.addf %237, %236 : vector<4x128xf32>
    %cst_77 = arith.constant 1.000000e+00 : f32
    %239 = vector.broadcast %cst_77 : f32 to vector<4x128xf32>
    %240 = arith.divf %239, %238 : vector<4x128xf32>
    %241 = math.tanh %233 : vector<4x128xf32>
    %242 = vector.extract_strided_slice %240 {offsets = [0, 0], sizes = [4, 32], strides = [1, 1]} : vector<4x128xf32> to vector<4x32xf32>
    %243 = vector.extract_strided_slice %240 {offsets = [0, 32], sizes = [4, 32], strides = [1, 1]} : vector<4x128xf32> to vector<4x32xf32>
    %244 = vector.extract_strided_slice %240 {offsets = [0, 96], sizes = [4, 32], strides = [1, 1]} : vector<4x128xf32> to vector<4x32xf32>
    %245 = vector.extract_strided_slice %241 {offsets = [0, 64], sizes = [4, 32], strides = [1, 1]} : vector<4x128xf32> to vector<4x32xf32>
    %246 = arith.mulf %243, %205 : vector<4x32xf32>
    %247 = arith.mulf %242, %245 : vector<4x32xf32>
    %248 = arith.addf %246, %247 : vector<4x32xf32>
    %249 = math.tanh %248 : vector<4x32xf32>
    %250 = arith.mulf %244, %249 : vector<4x32xf32>
    %cst_78 = arith.constant dense<0.000000e+00> : vector<4x128xf32>
    %251 = tpu.matmul %250, %1, %cst_78 {dimension_numbers = #tpu.dot_dimension_numbers<[1], [0], [0], [1], [0, 0, 1, 1], [], []>} : vector<4x32xf32>, vector<32x128xf32>, vector<4x128xf32> -> vector<4x128xf32>
    %cst_79 = arith.constant dense<0.000000e+00> : vector<4x128xf32>
    %252 = tpu.matmul %228, %2, %cst_79 {dimension_numbers = #tpu.dot_dimension_numbers<[1], [0], [0], [1], [0, 0, 1, 1], [], []>} : vector<4x32xf32>, vector<32x128xf32>, vector<4x128xf32> -> vector<4x128xf32>
    %253 = arith.addf %251, %252 : vector<4x128xf32>
    %254 = arith.addf %253, %5 : vector<4x128xf32>
    %cst_80 = arith.constant 0.000000e+00 : f32
    %255 = vector.broadcast %cst_80 : f32 to vector<4x128xf32>
    %256 = arith.subf %255, %254 : vector<4x128xf32>
    %257 = math.exp %256 : vector<4x128xf32>
    %cst_81 = arith.constant 1.000000e+00 : f32
    %258 = vector.broadcast %cst_81 : f32 to vector<4x128xf32>
    %259 = arith.addf %258, %257 : vector<4x128xf32>
    %cst_82 = arith.constant 1.000000e+00 : f32
    %260 = vector.broadcast %cst_82 : f32 to vector<4x128xf32>
    %261 = arith.divf %260, %259 : vector<4x128xf32>
    %262 = math.tanh %254 : vector<4x128xf32>
    %263 = vector.extract_strided_slice %261 {offsets = [0, 0], sizes = [4, 32], strides = [1, 1]} : vector<4x128xf32> to vector<4x32xf32>
    %264 = vector.extract_strided_slice %261 {offsets = [0, 32], sizes = [4, 32], strides = [1, 1]} : vector<4x128xf32> to vector<4x32xf32>
    %265 = vector.extract_strided_slice %261 {offsets = [0, 96], sizes = [4, 32], strides = [1, 1]} : vector<4x128xf32> to vector<4x32xf32>
    %266 = vector.extract_strided_slice %262 {offsets = [0, 64], sizes = [4, 32], strides = [1, 1]} : vector<4x128xf32> to vector<4x32xf32>
    %267 = arith.mulf %264, %226 : vector<4x32xf32>
    %268 = arith.mulf %263, %266 : vector<4x32xf32>
    %269 = arith.addf %267, %268 : vector<4x32xf32>
    %270 = math.tanh %269 : vector<4x32xf32>
    %271 = arith.mulf %265, %270 : vector<4x32xf32>
    %c6_i32 = arith.constant 6 : i32
    %272 = arith.index_cast %c6_i32 : i32 to index
    %c0_83 = arith.constant 0 : index
    %c0_84 = arith.constant 0 : index
    %273 = vector.load %arg1[%272, %c0_83, %c0_84] : memref<8x4x128xf32, #tpu.memory_space<vmem>>, vector<1x4x128xf32>
    %274 = vector.shape_cast %273 : vector<1x4x128xf32> to vector<4x128xf32>
    %cst_85 = arith.constant dense<0.000000e+00> : vector<4x128xf32>
    %275 = tpu.matmul %250, %0, %cst_85 {dimension_numbers = #tpu.dot_dimension_numbers<[1], [0], [0], [1], [0, 0, 1, 1], [], []>} : vector<4x32xf32>, vector<32x128xf32>, vector<4x128xf32> -> vector<4x128xf32>
    %276 = arith.addf %274, %275 : vector<4x128xf32>
    %cst_86 = arith.constant 0.000000e+00 : f32
    %277 = vector.broadcast %cst_86 : f32 to vector<4x128xf32>
    %278 = arith.subf %277, %276 : vector<4x128xf32>
    %279 = math.exp %278 : vector<4x128xf32>
    %cst_87 = arith.constant 1.000000e+00 : f32
    %280 = vector.broadcast %cst_87 : f32 to vector<4x128xf32>
    %281 = arith.addf %280, %279 : vector<4x128xf32>
    %cst_88 = arith.constant 1.000000e+00 : f32
    %282 = vector.broadcast %cst_88 : f32 to vector<4x128xf32>
    %283 = arith.divf %282, %281 : vector<4x128xf32>
    %284 = math.tanh %276 : vector<4x128xf32>
    %285 = vector.extract_strided_slice %283 {offsets = [0, 0], sizes = [4, 32], strides = [1, 1]} : vector<4x128xf32> to vector<4x32xf32>
    %286 = vector.extract_strided_slice %283 {offsets = [0, 32], sizes = [4, 32], strides = [1, 1]} : vector<4x128xf32> to vector<4x32xf32>
    %287 = vector.extract_strided_slice %283 {offsets = [0, 96], sizes = [4, 32], strides = [1, 1]} : vector<4x128xf32> to vector<4x32xf32>
    %288 = vector.extract_strided_slice %284 {offsets = [0, 64], sizes = [4, 32], strides = [1, 1]} : vector<4x128xf32> to vector<4x32xf32>
    %289 = arith.mulf %286, %248 : vector<4x32xf32>
    %290 = arith.mulf %285, %288 : vector<4x32xf32>
    %291 = arith.addf %289, %290 : vector<4x32xf32>
    %292 = math.tanh %291 : vector<4x32xf32>
    %293 = arith.mulf %287, %292 : vector<4x32xf32>
    %cst_89 = arith.constant dense<0.000000e+00> : vector<4x128xf32>
    %294 = tpu.matmul %293, %1, %cst_89 {dimension_numbers = #tpu.dot_dimension_numbers<[1], [0], [0], [1], [0, 0, 1, 1], [], []>} : vector<4x32xf32>, vector<32x128xf32>, vector<4x128xf32> -> vector<4x128xf32>
    %cst_90 = arith.constant dense<0.000000e+00> : vector<4x128xf32>
    %295 = tpu.matmul %271, %2, %cst_90 {dimension_numbers = #tpu.dot_dimension_numbers<[1], [0], [0], [1], [0, 0, 1, 1], [], []>} : vector<4x32xf32>, vector<32x128xf32>, vector<4x128xf32> -> vector<4x128xf32>
    %296 = arith.addf %294, %295 : vector<4x128xf32>
    %297 = arith.addf %296, %5 : vector<4x128xf32>
    %cst_91 = arith.constant 0.000000e+00 : f32
    %298 = vector.broadcast %cst_91 : f32 to vector<4x128xf32>
    %299 = arith.subf %298, %297 : vector<4x128xf32>
    %300 = math.exp %299 : vector<4x128xf32>
    %cst_92 = arith.constant 1.000000e+00 : f32
    %301 = vector.broadcast %cst_92 : f32 to vector<4x128xf32>
    %302 = arith.addf %301, %300 : vector<4x128xf32>
    %cst_93 = arith.constant 1.000000e+00 : f32
    %303 = vector.broadcast %cst_93 : f32 to vector<4x128xf32>
    %304 = arith.divf %303, %302 : vector<4x128xf32>
    %305 = math.tanh %297 : vector<4x128xf32>
    %306 = vector.extract_strided_slice %304 {offsets = [0, 0], sizes = [4, 32], strides = [1, 1]} : vector<4x128xf32> to vector<4x32xf32>
    %307 = vector.extract_strided_slice %304 {offsets = [0, 32], sizes = [4, 32], strides = [1, 1]} : vector<4x128xf32> to vector<4x32xf32>
    %308 = vector.extract_strided_slice %304 {offsets = [0, 96], sizes = [4, 32], strides = [1, 1]} : vector<4x128xf32> to vector<4x32xf32>
    %309 = vector.extract_strided_slice %305 {offsets = [0, 64], sizes = [4, 32], strides = [1, 1]} : vector<4x128xf32> to vector<4x32xf32>
    %310 = arith.mulf %307, %269 : vector<4x32xf32>
    %311 = arith.mulf %306, %309 : vector<4x32xf32>
    %312 = arith.addf %310, %311 : vector<4x32xf32>
    %313 = math.tanh %312 : vector<4x32xf32>
    %314 = arith.mulf %308, %313 : vector<4x32xf32>
    %c7_i32 = arith.constant 7 : i32
    %315 = arith.index_cast %c7_i32 : i32 to index
    %c0_94 = arith.constant 0 : index
    %c0_95 = arith.constant 0 : index
    %316 = vector.load %arg1[%315, %c0_94, %c0_95] : memref<8x4x128xf32, #tpu.memory_space<vmem>>, vector<1x4x128xf32>
    %317 = vector.shape_cast %316 : vector<1x4x128xf32> to vector<4x128xf32>
    %cst_96 = arith.constant dense<0.000000e+00> : vector<4x128xf32>
    %318 = tpu.matmul %293, %0, %cst_96 {dimension_numbers = #tpu.dot_dimension_numbers<[1], [0], [0], [1], [0, 0, 1, 1], [], []>} : vector<4x32xf32>, vector<32x128xf32>, vector<4x128xf32> -> vector<4x128xf32>
    %319 = arith.addf %317, %318 : vector<4x128xf32>
    %cst_97 = arith.constant 0.000000e+00 : f32
    %320 = vector.broadcast %cst_97 : f32 to vector<4x128xf32>
    %321 = arith.subf %320, %319 : vector<4x128xf32>
    %322 = math.exp %321 : vector<4x128xf32>
    %cst_98 = arith.constant 1.000000e+00 : f32
    %323 = vector.broadcast %cst_98 : f32 to vector<4x128xf32>
    %324 = arith.addf %323, %322 : vector<4x128xf32>
    %cst_99 = arith.constant 1.000000e+00 : f32
    %325 = vector.broadcast %cst_99 : f32 to vector<4x128xf32>
    %326 = arith.divf %325, %324 : vector<4x128xf32>
    %327 = math.tanh %319 : vector<4x128xf32>
    %328 = vector.extract_strided_slice %326 {offsets = [0, 0], sizes = [4, 32], strides = [1, 1]} : vector<4x128xf32> to vector<4x32xf32>
    %329 = vector.extract_strided_slice %326 {offsets = [0, 32], sizes = [4, 32], strides = [1, 1]} : vector<4x128xf32> to vector<4x32xf32>
    %330 = vector.extract_strided_slice %326 {offsets = [0, 96], sizes = [4, 32], strides = [1, 1]} : vector<4x128xf32> to vector<4x32xf32>
    %331 = vector.extract_strided_slice %327 {offsets = [0, 64], sizes = [4, 32], strides = [1, 1]} : vector<4x128xf32> to vector<4x32xf32>
    %332 = arith.mulf %329, %291 : vector<4x32xf32>
    %333 = arith.mulf %328, %331 : vector<4x32xf32>
    %334 = arith.addf %332, %333 : vector<4x32xf32>
    %335 = math.tanh %334 : vector<4x32xf32>
    %336 = arith.mulf %330, %335 : vector<4x32xf32>
    %cst_100 = arith.constant dense<0.000000e+00> : vector<4x128xf32>
    %337 = tpu.matmul %336, %1, %cst_100 {dimension_numbers = #tpu.dot_dimension_numbers<[1], [0], [0], [1], [0, 0, 1, 1], [], []>} : vector<4x32xf32>, vector<32x128xf32>, vector<4x128xf32> -> vector<4x128xf32>
    %cst_101 = arith.constant dense<0.000000e+00> : vector<4x128xf32>
    %338 = tpu.matmul %314, %2, %cst_101 {dimension_numbers = #tpu.dot_dimension_numbers<[1], [0], [0], [1], [0, 0, 1, 1], [], []>} : vector<4x32xf32>, vector<32x128xf32>, vector<4x128xf32> -> vector<4x128xf32>
    %339 = arith.addf %337, %338 : vector<4x128xf32>
    %340 = arith.addf %339, %5 : vector<4x128xf32>
    %cst_102 = arith.constant 0.000000e+00 : f32
    %341 = vector.broadcast %cst_102 : f32 to vector<4x128xf32>
    %342 = arith.subf %341, %340 : vector<4x128xf32>
    %343 = math.exp %342 : vector<4x128xf32>
    %cst_103 = arith.constant 1.000000e+00 : f32
    %344 = vector.broadcast %cst_103 : f32 to vector<4x128xf32>
    %345 = arith.addf %344, %343 : vector<4x128xf32>
    %cst_104 = arith.constant 1.000000e+00 : f32
    %346 = vector.broadcast %cst_104 : f32 to vector<4x128xf32>
    %347 = arith.divf %346, %345 : vector<4x128xf32>
    %348 = math.tanh %340 : vector<4x128xf32>
    %349 = vector.extract_strided_slice %347 {offsets = [0, 0], sizes = [4, 32], strides = [1, 1]} : vector<4x128xf32> to vector<4x32xf32>
    %350 = vector.extract_strided_slice %347 {offsets = [0, 32], sizes = [4, 32], strides = [1, 1]} : vector<4x128xf32> to vector<4x32xf32>
    %351 = vector.extract_strided_slice %347 {offsets = [0, 96], sizes = [4, 32], strides = [1, 1]} : vector<4x128xf32> to vector<4x32xf32>
    %352 = vector.extract_strided_slice %348 {offsets = [0, 64], sizes = [4, 32], strides = [1, 1]} : vector<4x128xf32> to vector<4x32xf32>
    %353 = arith.mulf %350, %312 : vector<4x32xf32>
    %354 = arith.mulf %349, %352 : vector<4x32xf32>
    %355 = arith.addf %353, %354 : vector<4x32xf32>
    %356 = math.tanh %355 : vector<4x32xf32>
    %357 = arith.mulf %351, %356 : vector<4x32xf32>
    %c8_i32 = arith.constant 8 : i32
    %c0_105 = arith.constant 0 : index
    %c0_106 = arith.constant 0 : index
    %358 = vector.load %arg6[%c0_105, %c0_106] : memref<1x32xf32, #tpu.memory_space<vmem>>, vector<1x32xf32>
    %359 = vector.broadcast %358 : vector<1x32xf32> to vector<4x32xf32>
    %360 = arith.mulf %357, %359 : vector<4x32xf32>
    %cst_107 = arith.constant dense<0.000000e+00> : vector<4xf32>
    %361 = vector.multi_reduction <add>, %360, %cst_107 [1] : vector<4x32xf32> to vector<4xf32>
    %362 = vector.shape_cast %361 : vector<4xf32> to vector<4x1xf32>
    %c0_108 = arith.constant 0 : index
    %c0_109 = arith.constant 0 : index
    %363 = vector.load %arg7[%c0_108, %c0_109] : memref<1x1xf32, #tpu.memory_space<vmem>>, vector<1x1xf32>
    %364 = vector.broadcast %363 : vector<1x1xf32> to vector<4x1xf32>
    %365 = arith.addf %362, %364 : vector<4x1xf32>
    %cst_110 = arith.constant 0.000000e+00 : f32
    %366 = vector.broadcast %cst_110 : f32 to vector<4x1xf32>
    %367 = arith.subf %366, %365 : vector<4x1xf32>
    %368 = math.exp %367 : vector<4x1xf32>
    %cst_111 = arith.constant 1.000000e+00 : f32
    %369 = vector.broadcast %cst_111 : f32 to vector<4x1xf32>
    %370 = arith.addf %369, %368 : vector<4x1xf32>
    %371 = tpu.reciprocal %370 {approx = true} : vector<4x1xf32> -> vector<4x1xf32>
    %c0_112 = arith.constant 0 : index
    %c0_113 = arith.constant 0 : index
    %372 = vector.load %arg10[%c0_112, %c0_113] : memref<4x1xf32, #tpu.memory_space<vmem>>, vector<4x1xf32>
    tpu.vector_store %arg10[%c0_112, %c0_113], %371 {strides = array<i32>} : memref<4x1xf32, #tpu.memory_space<vmem>>, vector<4x1xf32>,
    %373 = tpu.concatenate %336, %357, %334, %355 in 1 : vector<4x32xf32>, vector<4x32xf32>, vector<4x32xf32>, vector<4x32xf32> -> vector<4x128xf32>
    %c0_114 = arith.constant 0 : index
    %c0_115 = arith.constant 0 : index
    %374 = vector.load %arg11[%c0_114, %c0_115] : memref<4x128xf32, #tpu.memory_space<vmem>>, vector<4x128xf32>
    tpu.vector_store %arg11[%c0_114, %c0_115], %373 {strides = array<i32>} : memref<4x128xf32, #tpu.memory_space<vmem>>, vector<4x128xf32>,
    return
  }
  func.func @transform_0(%arg0: i32) -> (i32, i32, i32) {
    %c0_i32 = arith.constant 0 : i32
    %c0_i32_0 = arith.constant 0 : i32
    %c0_i32_1 = arith.constant 0 : i32
    %c0_i32_2 = arith.constant 0 : i32
    return %c0_i32, %c0_i32_0, %c0_i32_1 : i32, i32, i32
  }
  func.func @transform_1(%arg0: i32) -> (i32, i32) {
    %c0_i32 = arith.constant 0 : i32
    %c0_i32_0 = arith.constant 0 : i32
    %c0_i32_1 = arith.constant 0 : i32
    return %c0_i32, %c0_i32_0 : i32, i32
  }
  func.func @transform_2(%arg0: i32) -> (i32, i32) {
    %c0_i32 = arith.constant 0 : i32
    %c0_i32_0 = arith.constant 0 : i32
    %c0_i32_1 = arith.constant 0 : i32
    return %c0_i32, %c0_i32_0 : i32, i32
  }
  func.func @transform_3(%arg0: i32) -> (i32, i32) {
    %c0_i32 = arith.constant 0 : i32
    %c0_i32_0 = arith.constant 0 : i32
    %c0_i32_1 = arith.constant 0 : i32
    return %c0_i32, %c0_i32_0 : i32, i32
  }
  func.func @transform_4(%arg0: i32) -> (i32, i32) {
    %c0_i32 = arith.constant 0 : i32
    %c0_i32_0 = arith.constant 0 : i32
    %c0_i32_1 = arith.constant 0 : i32
    return %c0_i32, %c0_i32_0 : i32, i32
  }
  func.func @transform_5(%arg0: i32) -> (i32, i32) {
    %c0_i32 = arith.constant 0 : i32
    %c0_i32_0 = arith.constant 0 : i32
    %c0_i32_1 = arith.constant 0 : i32
    return %c0_i32, %c0_i32_0 : i32, i32
  }
  func.func @transform_6(%arg0: i32) -> (i32, i32) {
    %c0_i32 = arith.constant 0 : i32
    %c0_i32_0 = arith.constant 0 : i32
    %c0_i32_1 = arith.constant 0 : i32
    return %c0_i32, %c0_i32_0 : i32, i32
  }
  func.func @transform_7(%arg0: i32) -> (i32, i32, i32) {
    %c0_i32 = arith.constant 0 : i32
    %c0_i32_0 = arith.constant 0 : i32
    %c0_i32_1 = arith.constant 0 : i32
    %c0_i32_2 = arith.constant 0 : i32
    return %c0_i32, %c0_i32_0, %c0_i32_1 : i32, i32, i32
  }
  func.func @transform_8(%arg0: i32) -> (i32, i32, i32) {
    %c0_i32 = arith.constant 0 : i32
    %c0_i32_0 = arith.constant 0 : i32
    %c0_i32_1 = arith.constant 0 : i32
    %c0_i32_2 = arith.constant 0 : i32
    return %c0_i32, %c0_i32_0, %c0_i32_1 : i32, i32, i32
  }
  func.func @transform_9(%arg0: i32) -> (i32, i32) {
    %c0_i32 = arith.constant 0 : i32
    %c0_i32_0 = arith.constant 0 : i32
    %c0_i32_1 = arith.constant 0 : i32
    return %c0_i32, %c0_i32_0 : i32, i32
  }
  func.func @transform_10(%arg0: i32) -> (i32, i32) {
    %c0_i32 = arith.constant 0 : i32
    %c0_i32_0 = arith.constant 0 : i32
    %c0_i32_1 = arith.constant 0 : i32
    return %c0_i32, %c0_i32_0 : i32, i32
  }
}

</mosaic_0001>

<bundles_post_ra>
// kernel: sentiment_forward.1
= control target key start
LH: loop header
LB: loop body
LE: loop exit
PB: predicated region body
PF: predicated region fallthrough
CT: control target
= control target key end

     0   :  { %v3008_v0 = vmov 0.0|0.0   ;;  %vm3009_vm0 = vmmov 0   ;;  %v3010_v4 = vmov 0.0   ;;  %vm62_vm1 = vcmask 261120   ;;  %s3011_s24 = smov 64   ;;  %s3012_s27 = smov 32   ;;  %s3468_s1 = inlined_call_operand.vmem [shape: f32[32,128], index: 1, kind: input, shape index: {}]   ;;  %s3469_s7 = inlined_call_operand.vmem [shape: f32[2,4,32], index: 7, kind: input, shape index: {}]   ;;  %s3470_s0 = inlined_call_operand.vmem [shape: f32[8,4,128], index: 0, kind: input, shape index: {}]   ;;  %s3471_s8 = inlined_call_operand.vmem [shape: f32[2,4,32], index: 8, kind: input, shape index: {}]   ;;  %s3472_s3 = inlined_call_operand.vmem [shape: f32[32,128], index: 3, kind: input, shape index: {}]   ;;  %s3473_s2 = inlined_call_operand.vmem [shape: f32[32,128], index: 2, kind: input, shape index: {}]   ;;  %s3474_s4 = inlined_call_operand.vmem [shape: f32[1,128], index: 4, kind: input, shape index: {}]   ;;  %s3475_s5 = inlined_call_operand.vmem [shape: f32[1,32], index: 5, kind: input, shape index: {}]   ;;  %s3476_s6 = inlined_call_operand.<no memory space> [shape: f32[1,1], index: 6, kind: input, shape index: {}]   ;;  %s3477_s10 = inlined_call_operand.vmem [shape: f32[4,128], index: 10, kind: output, shape index: {1}]   ;;  %s3478_s9 = inlined_call_operand.vmem [shape: f32[4,1], index: 9, kind: output, shape index: {0}]  }
   0x1   :  { %2726 = vmatprep.subr.bf16.mxu0 %v3008_v0  ;;  %v36_v1 = vld [vmem:[%s3468_s1] sm:$0xff]  ;;  %v37_v2 = vld [vmem:[%s3468_s1 + $0x8] sm:$0xff]  ;;  %v38_v3 = vld [vmem:[%s3468_s1 + $0x10] sm:$0xff]  ;;  %2470 = vmatprep.mubr.msk.f32.mxu0 %vm3009_vm0, %v3010_v4  ;;  %s3013_s21 = smov 96   ;;  %vm2260_vm2 = vcmask 257024   ;;  %vm2293_vm3 = vcmask 523264  }
   0x2   :  { %v3081_v5 = vpack.c.bf16 %v37_v2, %v36_v1  ;;  %v39_v6 = vld [vmem:[%s3468_s1 + $0x18] sm:$0xff]  ;;  %2732 = vmatprep.subr.bf16.mxu1 %v3008_v0  ;;  %2481 = vmatprep.mubr.msk.f32.mxu1 %vm3009_vm0, %v3010_v4  ;;  %v55_v8 = vld [vmem:[%s3469_s7] sm:$0xf]  ;;  %v45_v27 = vld [vmem:[%s3472_s3 + $0x8] sm:$0xff]  ;;  %vm2295_vm4 = vcmask 785408   ;;  %vm2277_vm5 = vcmask 3072  }
   0x3   :  { %v3090_v7 = vpack.c.bf16 %v39_v6, %v38_v3  ;;  %v61_v9 = vld [vmem:[%s3470_s0] sm:$0xf]  ;;  %v46_v28 = vld [vmem:[%s3472_s3 + $0x10] sm:$0xff]  ;;  %v47_v30 = vld [vmem:[%s3472_s3 + $0x18] sm:$0xff] }
   0x4   :  { %2728 = vmatpush3.bf16.msra.mxu0 %v3081_v5  ;;  %v56_v14 = vld [vmem:[%s3471_s8] sm:$0xf]  ;;  %v41_v32 = vld [vmem:[%s3473_s2 + $0x8] sm:$0xff]  ;;  %v42_v34 = vld [vmem:[%s3473_s2 + $0x10] sm:$0xff]  ;;  %v3142_v36 = vpack.c.bf16 %v47_v30, %v46_v28 }
   0x5   :  { %2729 = vmatprep.subr.bf16.mxu0 %v3008_v0  ;;  %v44_v26 = vld [vmem:[%s3472_s3] sm:$0xff]  ;;  %v43_v35 = vld [vmem:[%s3473_s2 + $0x18] sm:$0xff] }
   0x6   :  { %v3122_v29 = vpack.c.bf16 %v45_v27, %v44_v26  ;;  %v40_v31 = vld [vmem:[%s3473_s2] sm:$0xff]  ;;  %v3146_v37 = vpack.c.bf16 %v43_v35, %v42_v34  ;;  %v2316_v34 = vld [vmem:[%s3470_s0 + $0x8] sm:$0xf] }
   0x7   :  { %v3133_v33 = vpack.c.bf16 %v41_v32, %v40_v31  ;;  %v2307_v38 = vld [vmem:[%s3469_s7 + $0x4] sm:$0xf]  ;;  %v3185_v46 = vld [vmem:[%s3474_s4] ss:$0 sm:$0xff] }
   0x8   :  { %2731 = vmatpush3.bf16.msra.mxu0 %v3090_v7  ;;  %2734 = vmatpush3.bf16.msra.mxu1 %v3122_v29  ;;  %v2312_v45 = vld [vmem:[%s3470_s0 + $0x4] sm:$0xf] }
   0x9   :  { %2738 = vmatprep.subr.bf16.mxu0 %v3008_v0  ;;  %2735 = vmatprep.subr.bf16.mxu1 %v3008_v0  ;;  %v2308_v56 = vld [vmem:[%s3471_s8 + $0x4] sm:$0xf] }
   0xb   :  { %2471 = vmatmul.mubr.msk.f32.vlgmr.msra.gmra.mrb[0].mxu0 %vm62_vm1, %v55_v8 }
   0xc   :  { %2492 = vmatprep.mubr.msk.f32.mxu0 %vm3009_vm0, %v3010_v4  ;;  %2740 = vmatpush3.bf16.msra.mxu0 %v3133_v33 }
   0xd   :  { %2741 = vmatprep.subr.bf16.mxu0 %v3008_v0  ;;  %2737 = vmatpush3.bf16.msra.mxu1 %v3142_v36 }
   0xe   :  { %2744 = vmatprep.subr.bf16.mxu1 %v3008_v0 }
  0x10   :  { %2743 = vmatpush3.bf16.msra.mxu0 %v3146_v37  ;;  %2482 = vmatmul.mubr.msk.f32.vlgmr.msra.gmra.mrb[0].mxu1 %vm62_vm1, %v2307_v38 }
  0x11   :  { %2750 = vmatprep.subr.bf16.mxu0 %v3008_v0  ;;  %2746 = vmatpush3.bf16.msra.mxu1 %v3081_v5 }
  0x12   :  { %2503 = vmatprep.mubr.msk.f32.mxu1 %vm3009_vm0, %v3010_v4  ;;  %2747 = vmatprep.subr.bf16.mxu1 %v3008_v0 }
  0x15   :  { %2749 = vmatpush3.bf16.msra.mxu1 %v3090_v7 }
  0x16   :  { %2756 = vmatprep.subr.bf16.mxu1 %v3008_v0 }
  0xde   :  { %v132_v10 = vpop.f32.mrb[0].mxu0 }
  0xdf   :  { %v136_v11 = vadd.f32 %v132_v10, %v61_v9  ;;  %v2472_v12 = vpop.f32.mrb[1].mxu0 }
  0xe1   :  { %2876 = vtanh.f32 %v136_v11  ;;  %v137_v15 = vsub.f32 0.0, %v136_v11 }
  0xe3   :  { %v138_v16 = vmul.f32 1.442695, %v137_v15  ;;  %v234_v42 = vpop.f32.mrb[0].mxu1 }
  0xe4   :  { %v2483_v43 = vpop.f32.mrb[1].mxu1 }
  0xe5   :  { %2878 = vpow2.f32 %v138_v16 }
  0xeb   :  { %v2877_v13 = vpop.eup %2876 }
  0xec   :  { %150 = vrot.lane.b32.xlu0 %v2877_v13, %s3011_s24 }
  0xef   :  { %v2879_v17 = vpop.eup %2878 }
  0xf0   :  { %145 = vrot.lane.b32.xlu0 %v56_v14, %s3012_s27  ;;  %v140_v18 = vadd.f32 1.0, %v2879_v17 }
  0xf2   :  { %2880 = vrcp.f32 %v140_v18 }
  0xfc   :  { %v2881_v19 = vpop.eup %2880 }
 0x15e   :  { %v151_v20 = vpop.permute.xlu0 %150 }
 0x15f   :  { %v153_v21 = vmul.f32 %v2881_v19, %v151_v20 }
 0x161   :  { %155 = vrot.lane.b32.xlu1 %v153_v21, %s3012_s27 }
 0x162   :  { %v146_v22 = vpop.permute.xlu0 %145 }
 0x163   :  { %v148_v23 = vmul.f32 %v2881_v19, %v146_v22 }
 0x1d3   :  { %v156_v24 = vpop.permute.xlu1 %155 }
 0x1d4   :  { %v3110_v25 = vadd.f32 %v156_v24, %v148_v23 }
 0x1d6   :  { %2882 = vtanh.f32 %v3110_v25 }
 0x1e0   :  { %v2883_v39 = vpop.eup %2882 }
 0x1e1   :  { %161 = vrot.lane.b32.xlu1 %v2883_v39, %s3011_s24 }
 0x253   :  { %v162_v40 = vpop.permute.xlu1 %161 }
 0x254   :  { %v164_v41 = vmul.f32 %v2881_v19, %v162_v40 }
 0x256   :  { %239 = vrot.lane.b32.xlu0 %v164_v41, %s3012_s27 }
 0x2c8   :  { %v240_v44 = vpop.permute.xlu0 %239 }
 0x2c9   :  { %2493 = vmatmul.mubr.msk.f32.vlgmr.msra.gmra.mrb[2].mxu0 %vm62_vm1, %v240_v44  ;;  %2504 = vmatmul.mubr.msk.f32.vlgmr.msra.gmra.mrb[2].mxu1 %vm62_vm1, %v240_v44 }
 0x2ca   :  { %2758 = vmatpush3.bf16.msra.mxu1 %v3133_v33  ;;  %2752 = vmatpush3.bf16.msra.mxu0 %v3122_v29 }
 0x2cb   :  { %2759 = vmatprep.subr.bf16.mxu1 %v3008_v0  ;;  %2753 = vmatprep.subr.bf16.mxu0 %v3008_v0 }
 0x2cc   :  { %2525 = vmatprep.mubr.msk.f32.mxu1 %vm3009_vm0, %v3010_v4  ;;  %2514 = vmatprep.mubr.msk.f32.mxu0 %vm3009_vm0, %v3010_v4 }
 0x2ce   :  { %2761 = vmatpush3.bf16.msra.mxu1 %v3146_v37  ;;  %2755 = vmatpush3.bf16.msra.mxu0 %v3142_v36 }
 0x2cf   :  { %2762 = vmatprep.subr.bf16.mxu0 %v3008_v0  ;;  %2768 = vmatprep.subr.bf16.mxu1 %v3008_v0 }
 0x39c   :  { %v309_v47 = vpop.f32.mrb[2].mxu0  ;;  %v410_v48 = vpop.f32.mrb[2].mxu1 }
 0x39d   :  { %v310_v49 = vadd.f32 %v309_v47, %v234_v42  ;;  %v414_v50 = vadd.f32 %v2312_v45, %v410_v48  ;;  %v2494_v51 = vpop.f32.mrb[3].mxu0  ;;  %v2505_v52 = vpop.f32.mrb[3].mxu1 }
 0x39f   :  { %v313_v53 = vadd.f32 %v3185_v46, %v310_v49  ;;  %2884 = vtanh.f32 %v414_v50  ;;  %v415_v57 = vsub.f32 0.0, %v414_v50 }
 0x3a1   :  { %2886 = vtanh.f32 %v313_v53  ;;  %v314_v58 = vsub.f32 0.0, %v313_v53  ;;  %v416_v59 = vmul.f32 1.442695, %v415_v57 }
 0x3a3   :  { %v315_v60 = vmul.f32 1.442695, %v314_v58  ;;  %2888 = vpow2.f32 %v416_v59 }
 0x3a5   :  { %2890 = vpow2.f32 %v315_v60 }
 0x3a9   :  { %v2885_v54 = vpop.eup %2884 }
 0x3aa   :  { %424 = vrot.lane.b32.xlu0 %v2885_v54, %s3011_s24 }
 0x3ab   :  { %v2887_v55 = vpop.eup %2886 }
 0x3ac   :  { %327 = vrot.lane.b32.xlu1 %v2887_v55, %s3011_s24 }
 0x3ad   :  { %v2889_v61 = vpop.eup %2888 }
 0x3ae   :  { %v418_v63 = vadd.f32 1.0, %v2889_v61 }
 0x3af   :  { %v2891_v62 = vpop.eup %2890 }
 0x3b0   :  { %322 = vrot.lane.b32.xlu1 %v2308_v56, %s3012_s27  ;;  %v317_v1 = vadd.f32 1.0, %v2891_v62  ;;  %2892 = vrcp.f32 %v418_v63 }
 0x3b2   :  { %2894 = vrcp.f32 %v317_v1 }
 0x3ba   :  { %v2893_v2 = vpop.eup %2892 }
 0x3bb   :  { %v422_v12 = vmul.f32 %v2893_v2, %v3110_v25 }
 0x3bc   :  { %v2895_v8 = vpop.eup %2894 }
 0x41c   :  { %v425_v3 = vpop.permute.xlu0 %424 }
 0x41d   :  { %v427_v6 = vmul.f32 %v2893_v2, %v425_v3 }
 0x41e   :  { %v328_v9 = vpop.permute.xlu1 %327 }
 0x41f   :  { %v330_v10 = vmul.f32 %v2895_v8, %v328_v9  ;;  %429 = vrot.lane.b32.xlu1 %v427_v6, %s3012_s27 }
 0x421   :  { %332 = vrot.lane.b32.xlu0 %v330_v10, %s3012_s27 }
 0x422   :  { %v323_v11 = vpop.permute.xlu1 %322 }
 0x423   :  { %v325_v14 = vmul.f32 %v2895_v8, %v323_v11 }
 0x491   :  { %v430_v13 = vpop.permute.xlu1 %429 }
 0x492   :  { %v3197_v15 = vadd.f32 %v430_v13, %v422_v12 }
 0x493   :  { %v333_v16 = vpop.permute.xlu0 %332 }
 0x494   :  { %2896 = vtanh.f32 %v3197_v15  ;;  %v3200_v17 = vadd.f32 %v333_v16, %v325_v14  ;;  %v2320_v14 = vld [vmem:[%s3470_s0 + $0xc] sm:$0xf] }
 0x496   :  { %2898 = vtanh.f32 %v3200_v17 }
 0x49e   :  { %v2897_v18 = vpop.eup %2896 }
 0x49f   :  { %435 = vrot.lane.b32.xlu1 %v2897_v18, %s3011_s24 }
 0x4a0   :  { %v2899_v19 = vpop.eup %2898 }
 0x4a1   :  { %338 = vrot.lane.b32.xlu0 %v2899_v19, %s3011_s24 }
 0x511   :  { %v436_v20 = vpop.permute.xlu1 %435 }
 0x512   :  { %v438_v21 = vmul.f32 %v2893_v2, %v436_v20 }
 0x513   :  { %v339_v22 = vpop.permute.xlu0 %338 }
 0x514   :  { %v341_v23 = vmul.f32 %v2895_v8, %v339_v22  ;;  %515 = vrot.lane.b32.xlu1 %v438_v21, %s3012_s27 }
 0x516   :  { %440 = vrot.lane.b32.xlu0 %v341_v23, %s3012_s27 }
 0x586   :  { %v516_v24 = vpop.permute.xlu1 %515 }
 0x587   :  { %2526 = vmatmul.mubr.msk.f32.vlgmr.msra.gmra.mrb[4].mxu1 %vm62_vm1, %v516_v24 }
 0x588   :  { %v441_v25 = vpop.permute.xlu0 %440  ;;  %2770 = vmatpush3.bf16.msra.mxu1 %v3122_v29  ;;  %2547 = vmatprep.mubr.msk.f32.mxu1 %vm3009_vm0, %v3010_v4 }
 0x589   :  { %2515 = vmatmul.mubr.msk.f32.vlgmr.msra.gmra.mrb[4].mxu0 %vm62_vm1, %v441_v25  ;;  %2771 = vmatprep.subr.bf16.mxu1 %v3008_v0 }
 0x58a   :  { %2764 = vmatpush3.bf16.msra.mxu0 %v3081_v5  ;;  %2536 = vmatprep.mubr.msk.f32.mxu0 %vm3009_vm0, %v3010_v4 }
 0x58b   :  { %2765 = vmatprep.subr.bf16.mxu0 %v3008_v0 }
 0x58c   :  { %2773 = vmatpush3.bf16.msra.mxu1 %v3142_v36 }
 0x58d   :  { %2780 = vmatprep.subr.bf16.mxu1 %v3008_v0 }
 0x58e   :  { %2767 = vmatpush3.bf16.msra.mxu0 %v3090_v7 }
 0x58f   :  { %2774 = vmatprep.subr.bf16.mxu0 %v3008_v0 }
 0x591   :  { %2537 = vmatmul.mubr.msk.f32.vlgmr.msra.gmra.mrb[6].mxu0 %vm62_vm1, %v516_v24 }
 0x592   :  { %2776 = vmatpush3.bf16.msra.mxu0 %v3133_v33  ;;  %2558 = vmatprep.mubr.msk.f32.mxu0 %vm3009_vm0, %v3010_v4 }
 0x593   :  { %2777 = vmatprep.subr.bf16.mxu0 %v3008_v0 }
 0x596   :  { %2779 = vmatpush3.bf16.msra.mxu0 %v3146_v37 }
 0x597   :  { %2786 = vmatprep.subr.bf16.mxu0 %v3008_v0 }
 0x65a   :  { %v585_v26 = vpop.f32.mrb[4].mxu1 }
 0x65b   :  { %v2527_v27 = vpop.f32.mrb[5].mxu1 }
 0x65c   :  { %v510_v28 = vpop.f32.mrb[4].mxu0 }
 0x65d   :  { %v586_v30 = vadd.f32 %v585_v26, %v510_v28  ;;  %v2516_v31 = vpop.f32.mrb[5].mxu0 }
 0x65f   :  { %v589_v32 = vadd.f32 %v3185_v46, %v586_v30 }
 0x661   :  { %2900 = vtanh.f32 %v589_v32  ;;  %v590_v42 = vsub.f32 0.0, %v589_v32 }
 0x663   :  { %v591_v43 = vmul.f32 1.442695, %v590_v42 }
 0x664   :  { %v682_v35 = vpop.f32.mrb[6].mxu0 }
 0x665   :  { %v686_v38 = vadd.f32 %v2316_v34, %v682_v35  ;;  %v2538_v39 = vpop.f32.mrb[7].mxu0 }
 0x667   :  { %2902 = vtanh.f32 %v686_v38  ;;  %v687_v44 = vsub.f32 0.0, %v686_v38 }
 0x668   :  { %2904 = vpow2.f32 %v591_v43 }
 0x669   :  { %v688_v45 = vmul.f32 1.442695, %v687_v44 }
 0x66b   :  { %v2901_v40 = vpop.eup %2900  ;;  %2906 = vpow2.f32 %v688_v45 }
 0x66c   :  { %599 = vrot.lane.b32.xlu0 %v2901_v40, %s3011_s24 }
 0x671   :  { %v2903_v41 = vpop.eup %2902 }
 0x672   :  { %696 = vrot.lane.b32.xlu1 %v2903_v41, %s3011_s24  ;;  %v2905_v47 = vpop.eup %2904 }
 0x673   :  { %v593_v48 = vadd.f32 1.0, %v2905_v47 }
 0x675   :  { %v2907_v49 = vpop.eup %2906  ;;  %2908 = vrcp.f32 %v593_v48 }
 0x676   :  { %v690_v50 = vadd.f32 1.0, %v2907_v49 }
 0x678   :  { %2910 = vrcp.f32 %v690_v50 }
 0x67f   :  { %v2909_v51 = vpop.eup %2908 }
 0x680   :  { %v597_v57 = vmul.f32 %v2909_v51, %v3200_v17 }
 0x682   :  { %v2911_v54 = vpop.eup %2910 }
 0x683   :  { %v694_v60 = vmul.f32 %v2911_v54, %v3197_v15 }
 0x6de   :  { %v600_v52 = vpop.permute.xlu0 %599 }
 0x6df   :  { %v602_v53 = vmul.f32 %v2909_v51, %v600_v52 }
 0x6e1   :  { %604 = vrot.lane.b32.xlu0 %v602_v53, %s3012_s27 }
 0x6e4   :  { %v697_v55 = vpop.permute.xlu1 %696 }
 0x6e5   :  { %v699_v56 = vmul.f32 %v2911_v54, %v697_v55 }
 0x6e7   :  { %701 = vrot.lane.b32.xlu1 %v699_v56, %s3012_s27 }
 0x753   :  { %v605_v58 = vpop.permute.xlu0 %604 }
 0x754   :  { %v3237_v59 = vadd.f32 %v605_v58, %v597_v57 }
 0x756   :  { %2912 = vtanh.f32 %v3237_v59 }
 0x759   :  { %v702_v61 = vpop.permute.xlu1 %701 }
 0x75a   :  { %v3241_v62 = vadd.f32 %v702_v61, %v694_v60 }
 0x75c   :  { %2914 = vtanh.f32 %v3241_v62 }
 0x760   :  { %v2913_v63 = vpop.eup %2912 }
 0x761   :  { %610 = vrot.lane.b32.xlu0 %v2913_v63, %s3011_s24 }
 0x766   :  { %v2915_v1 = vpop.eup %2914 }
 0x767   :  { %707 = vrot.lane.b32.xlu1 %v2915_v1, %s3011_s24 }
 0x7d3   :  { %v611_v2 = vpop.permute.xlu0 %610 }
 0x7d4   :  { %v613_v3 = vmul.f32 %v2909_v51, %v611_v2 }
 0x7d6   :  { %712 = vrot.lane.b32.xlu0 %v613_v3, %s3012_s27 }
 0x7d9   :  { %v708_v6 = vpop.permute.xlu1 %707 }
 0x7da   :  { %v710_v8 = vmul.f32 %v2911_v54, %v708_v6 }
 0x7dc   :  { %787 = vrot.lane.b32.xlu1 %v710_v8, %s3012_s27 }
 0x848   :  { %v713_v9 = vpop.permute.xlu0 %712 }
 0x849   :  { %2548 = vmatmul.mubr.msk.f32.vlgmr.msra.gmra.mrb[6].mxu1 %vm62_vm1, %v713_v9 }
 0x84a   :  { %2782 = vmatpush3.bf16.msra.mxu1 %v3081_v5  ;;  %2569 = vmatprep.mubr.msk.f32.mxu1 %vm3009_vm0, %v3010_v4 }
 0x84b   :  { %2783 = vmatprep.subr.bf16.mxu1 %v3008_v0 }
 0x84e   :  { %2785 = vmatpush3.bf16.msra.mxu1 %v3090_v7  ;;  %v788_v10 = vpop.permute.xlu1 %787 }
 0x84f   :  { %2559 = vmatmul.mubr.msk.f32.vlgmr.msra.gmra.mrb[8].mxu0 %vm62_vm1, %v788_v10  ;;  %2792 = vmatprep.subr.bf16.mxu1 %v3008_v0 }
 0x850   :  { %2788 = vmatpush3.bf16.msra.mxu0 %v3122_v29  ;;  %2580 = vmatprep.mubr.msk.f32.mxu0 %vm3009_vm0, %v3010_v4 }
 0x851   :  { %2570 = vmatmul.mubr.msk.f32.vlgmr.msra.gmra.mrb[8].mxu1 %vm62_vm1, %v788_v10  ;;  %2789 = vmatprep.subr.bf16.mxu0 %v3008_v0 }
 0x852   :  { %2794 = vmatpush3.bf16.msra.mxu1 %v3133_v33  ;;  %2591 = vmatprep.mubr.msk.f32.mxu1 %vm3009_vm0, %v3010_v4 }
 0x853   :  { %2795 = vmatprep.subr.bf16.mxu1 %v3008_v0 }
 0x854   :  { %2791 = vmatpush3.bf16.msra.mxu0 %v3142_v36 }
 0x855   :  { %2798 = vmatprep.subr.bf16.mxu0 %v3008_v0 }
 0x856   :  { %2797 = vmatpush3.bf16.msra.mxu1 %v3146_v37 }
 0x857   :  { %2804 = vmatprep.subr.bf16.mxu1 %v3008_v0 }
 0x91c   :  { %v782_v11 = vpop.f32.mrb[6].mxu1 }
 0x91d   :  { %v2549_v12 = vpop.f32.mrb[7].mxu1 }
 0x922   :  { %v857_v13 = vpop.f32.mrb[8].mxu0 }
 0x923   :  { %v858_v15 = vadd.f32 %v857_v13, %v782_v11  ;;  %v2560_v16 = vpop.f32.mrb[9].mxu0 }
 0x924   :  { %v954_v17 = vpop.f32.mrb[8].mxu1 }
 0x925   :  { %v861_v18 = vadd.f32 %v3185_v46, %v858_v15  ;;  %v958_v19 = vadd.f32 %v2320_v14, %v954_v17  ;;  %v2571_v20 = vpop.f32.mrb[9].mxu1 }
 0x927   :  { %2916 = vtanh.f32 %v861_v18  ;;  %v862_v23 = vsub.f32 0.0, %v861_v18  ;;  %v959_v24 = vsub.f32 0.0, %v958_v19 }
 0x928   :  { %2918 = vtanh.f32 %v958_v19 }
 0x929   :  { %v863_v25 = vmul.f32 1.442695, %v862_v23  ;;  %v960_v26 = vmul.f32 1.442695, %v959_v24 }
 0x92b   :  { %2920 = vpow2.f32 %v863_v25 }
 0x92c   :  { %2922 = vpow2.f32 %v960_v26 }
 0x931   :  { %v2917_v21 = vpop.eup %2916 }
 0x932   :  { %v2919_v22 = vpop.eup %2918  ;;  %871 = vrot.lane.b32.xlu0 %v2917_v21, %s3011_s24 }
 0x933   :  { %968 = vrot.lane.b32.xlu1 %v2919_v22, %s3011_s24 }
 0x935   :  { %v2921_v27 = vpop.eup %2920 }
 0x936   :  { %v2923_v28 = vpop.eup %2922  ;;  %v865_v30 = vadd.f32 1.0, %v2921_v27 }
 0x937   :  { %v962_v31 = vadd.f32 1.0, %v2923_v28 }
 0x938   :  { %2924 = vrcp.f32 %v865_v30 }
 0x939   :  { %2926 = vrcp.f32 %v962_v31 }
 0x942   :  { %v2925_v32 = vpop.eup %2924 }
 0x943   :  { %v2927_v35 = vpop.eup %2926  ;;  %v869_v41 = vmul.f32 %v2925_v32, %v3237_v59 }
 0x944   :  { %v966_v42 = vmul.f32 %v2927_v35, %v3241_v62  ;;  %v2324_v62 = vld [vmem:[%s3470_s0 + $0x10] sm:$0xf] }
 0x9a4   :  { %v872_v34 = vpop.permute.xlu0 %871 }
 0x9a5   :  { %v969_v38 = vpop.permute.xlu1 %968  ;;  %v874_v39 = vmul.f32 %v2925_v32, %v872_v34 }
 0x9a6   :  { %v971_v40 = vmul.f32 %v2927_v35, %v969_v38 }
 0x9a7   :  { %876 = vrot.lane.b32.xlu0 %v874_v39, %s3012_s27 }
 0x9a8   :  { %973 = vrot.lane.b32.xlu1 %v971_v40, %s3012_s27 }
 0xa19   :  { %v877_v43 = vpop.permute.xlu0 %876 }
 0xa1a   :  { %v974_v44 = vpop.permute.xlu1 %973  ;;  %v3279_v45 = vadd.f32 %v877_v43, %v869_v41 }
 0xa1b   :  { %v3281_v47 = vadd.f32 %v974_v44, %v966_v42 }
 0xa1c   :  { %2928 = vtanh.f32 %v3279_v45 }
 0xa1d   :  { %2930 = vtanh.f32 %v3281_v47 }
 0xa26   :  { %v2929_v48 = vpop.eup %2928 }
 0xa27   :  { %v2931_v49 = vpop.eup %2930  ;;  %882 = vrot.lane.b32.xlu0 %v2929_v48, %s3011_s24 }
 0xa28   :  { %979 = vrot.lane.b32.xlu1 %v2931_v49, %s3011_s24 }
 0xa99   :  { %v883_v50 = vpop.permute.xlu0 %882 }
 0xa9a   :  { %v980_v51 = vpop.permute.xlu1 %979  ;;  %v885_v52 = vmul.f32 %v2925_v32, %v883_v50 }
 0xa9b   :  { %v982_v53 = vmul.f32 %v2927_v35, %v980_v51 }
 0xa9c   :  { %984 = vrot.lane.b32.xlu0 %v885_v52, %s3012_s27 }
 0xa9d   :  { %1059 = vrot.lane.b32.xlu1 %v982_v53, %s3012_s27 }
 0xb0e   :  { %v985_v54 = vpop.permute.xlu0 %984 }
 0xb0f   :  { %v1060_v55 = vpop.permute.xlu1 %1059  ;;  %2581 = vmatmul.mubr.msk.f32.vlgmr.msra.gmra.mrb[10].mxu0 %vm62_vm1, %v985_v54 }
 0xb10   :  { %2592 = vmatmul.mubr.msk.f32.vlgmr.msra.gmra.mrb[10].mxu1 %vm62_vm1, %v1060_v55  ;;  %2800 = vmatpush3.bf16.msra.mxu0 %v3081_v5 }
 0xb11   :  { %2801 = vmatprep.subr.bf16.mxu0 %v3008_v0  ;;  %2602 = vmatprep.mubr.msk.f32.mxu0 %vm3009_vm0, %v3010_v4 }
 0xb12   :  { %2806 = vmatpush3.bf16.msra.mxu1 %v3122_v29  ;;  %2613 = vmatprep.mubr.msk.f32.mxu1 %vm3009_vm0, %v3010_v4 }
 0xb13   :  { %2807 = vmatprep.subr.bf16.mxu1 %v3008_v0 }
 0xb14   :  { %2803 = vmatpush3.bf16.msra.mxu0 %v3090_v7 }
 0xb15   :  { %2810 = vmatprep.subr.bf16.mxu0 %v3008_v0 }
 0xb16   :  { %2809 = vmatpush3.bf16.msra.mxu1 %v3142_v36 }
 0xb17   :  { %2603 = vmatmul.mubr.msk.f32.vlgmr.msra.gmra.mrb[12].mxu0 %vm62_vm1, %v1060_v55  ;;  %2816 = vmatprep.subr.bf16.mxu1 %v3008_v0 }
 0xb18   :  { %2812 = vmatpush3.bf16.msra.mxu0 %v3133_v33  ;;  %2624 = vmatprep.mubr.msk.f32.mxu0 %vm3009_vm0, %v3010_v4 }
 0xb19   :  { %2813 = vmatprep.subr.bf16.mxu0 %v3008_v0 }
 0xb1c   :  { %2815 = vmatpush3.bf16.msra.mxu0 %v3146_v37 }
 0xb1d   :  { %2822 = vmatprep.subr.bf16.mxu0 %v3008_v0 }
 0xbe2   :  { %v1054_v56 = vpop.f32.mrb[10].mxu0 }
 0xbe3   :  { %v1129_v57 = vpop.f32.mrb[10].mxu1  ;;  %v2582_v58 = vpop.f32.mrb[11].mxu0 }
 0xbe4   :  { %v1130_v59 = vadd.f32 %v1129_v57, %v1054_v56  ;;  %v2593_v60 = vpop.f32.mrb[11].mxu1 }
 0xbe6   :  { %v1133_v61 = vadd.f32 %v3185_v46, %v1130_v59 }
 0xbe8   :  { %2932 = vtanh.f32 %v1133_v61  ;;  %v1134_v8 = vsub.f32 0.0, %v1133_v61 }
 0xbea   :  { %v1226_v63 = vpop.f32.mrb[12].mxu0  ;;  %v1135_v9 = vmul.f32 1.442695, %v1134_v8 }
 0xbeb   :  { %v1230_v1 = vadd.f32 %v2324_v62, %v1226_v63  ;;  %v2604_v2 = vpop.f32.mrb[13].mxu0 }
 0xbed   :  { %2934 = vtanh.f32 %v1230_v1  ;;  %v1231_v10 = vsub.f32 0.0, %v1230_v1 }
 0xbee   :  { %2936 = vpow2.f32 %v1135_v9 }
 0xbef   :  { %v1232_v11 = vmul.f32 1.442695, %v1231_v10 }
 0xbf1   :  { %2938 = vpow2.f32 %v1232_v11 }
 0xbf2   :  { %v2933_v3 = vpop.eup %2932 }
 0xbf3   :  { %1143 = vrot.lane.b32.xlu0 %v2933_v3, %s3011_s24 }
 0xbf7   :  { %v2935_v6 = vpop.eup %2934 }
 0xbf8   :  { %1240 = vrot.lane.b32.xlu1 %v2935_v6, %s3011_s24  ;;  %v2937_v12 = vpop.eup %2936 }
 0xbf9   :  { %v1137_v13 = vadd.f32 1.0, %v2937_v12 }
 0xbfb   :  { %v2939_v14 = vpop.eup %2938  ;;  %2940 = vrcp.f32 %v1137_v13 }
 0xbfc   :  { %v1234_v15 = vadd.f32 1.0, %v2939_v14 }
 0xbfe   :  { %2942 = vrcp.f32 %v1234_v15 }
 0xc05   :  { %v2941_v16 = vpop.eup %2940 }
 0xc06   :  { %v1141_v22 = vmul.f32 %v2941_v16, %v3279_v45  ;;  %v2328_v45 = vld [vmem:[%s3470_s0 + $0x14] sm:$0xf] }
 0xc08   :  { %v2943_v19 = vpop.eup %2942 }
 0xc09   :  { %v1238_v25 = vmul.f32 %v2943_v19, %v3281_v47 }
 0xc65   :  { %v1144_v17 = vpop.permute.xlu0 %1143 }
 0xc66   :  { %v1146_v18 = vmul.f32 %v2941_v16, %v1144_v17 }
 0xc68   :  { %1148 = vrot.lane.b32.xlu0 %v1146_v18, %s3012_s27 }
 0xc6a   :  { %v1241_v20 = vpop.permute.xlu1 %1240 }
 0xc6b   :  { %v1243_v21 = vmul.f32 %v2943_v19, %v1241_v20 }
 0xc6d   :  { %1245 = vrot.lane.b32.xlu1 %v1243_v21, %s3012_s27 }
 0xcda   :  { %v1149_v23 = vpop.permute.xlu0 %1148 }
 0xcdb   :  { %v3319_v24 = vadd.f32 %v1149_v23, %v1141_v22 }
 0xcdd   :  { %2944 = vtanh.f32 %v3319_v24 }
 0xcdf   :  { %v1246_v26 = vpop.permute.xlu1 %1245 }
 0xce0   :  { %v3323_v27 = vadd.f32 %v1246_v26, %v1238_v25 }
 0xce2   :  { %2946 = vtanh.f32 %v3323_v27 }
 0xce7   :  { %v2945_v28 = vpop.eup %2944 }
 0xce8   :  { %1154 = vrot.lane.b32.xlu0 %v2945_v28, %s3011_s24 }
 0xcec   :  { %v2947_v30 = vpop.eup %2946 }
 0xced   :  { %1251 = vrot.lane.b32.xlu1 %v2947_v30, %s3011_s24 }
 0xd5a   :  { %v1155_v31 = vpop.permute.xlu0 %1154 }
 0xd5b   :  { %v1157_v32 = vmul.f32 %v2941_v16, %v1155_v31 }
 0xd5d   :  { %1256 = vrot.lane.b32.xlu0 %v1157_v32, %s3012_s27 }
 0xd5f   :  { %v1252_v34 = vpop.permute.xlu1 %1251 }
 0xd60   :  { %v1254_v35 = vmul.f32 %v2943_v19, %v1252_v34 }
 0xd62   :  { %1331 = vrot.lane.b32.xlu1 %v1254_v35, %s3012_s27 }
 0xdcf   :  { %v1257_v38 = vpop.permute.xlu0 %1256 }
 0xdd0   :  { %2614 = vmatmul.mubr.msk.f32.vlgmr.msra.gmra.mrb[12].mxu1 %vm62_vm1, %v1257_v38 }
 0xdd1   :  { %2818 = vmatpush3.bf16.msra.mxu1 %v3081_v5  ;;  %2635 = vmatprep.mubr.msk.f32.mxu1 %vm3009_vm0, %v3010_v4 }
 0xdd2   :  { %2819 = vmatprep.subr.bf16.mxu1 %v3008_v0 }
 0xdd4   :  { %v1332_v39 = vpop.permute.xlu1 %1331 }
 0xdd5   :  { %2821 = vmatpush3.bf16.msra.mxu1 %v3090_v7  ;;  %2625 = vmatmul.mubr.msk.f32.vlgmr.msra.gmra.mrb[14].mxu0 %vm62_vm1, %v1332_v39 }
 0xdd6   :  { %2824 = vmatpush3.bf16.msra.mxu0 %v3122_v29  ;;  %2828 = vmatprep.subr.bf16.mxu1 %v3008_v0 }
 0xdd7   :  { %2825 = vmatprep.subr.bf16.mxu0 %v3008_v0  ;;  %2646 = vmatprep.mubr.msk.f32.mxu0 %vm3009_vm0, %v3010_v4 }
 0xdd8   :  { %2636 = vmatmul.mubr.msk.f32.vlgmr.msra.gmra.mrb[14].mxu1 %vm62_vm1, %v1332_v39 }
 0xdd9   :  { %2830 = vmatpush3.bf16.msra.mxu1 %v3133_v33  ;;  %2657 = vmatprep.mubr.msk.f32.mxu1 %vm3009_vm0, %v3010_v4 }
 0xdda   :  { %2827 = vmatpush3.bf16.msra.mxu0 %v3142_v36  ;;  %2831 = vmatprep.subr.bf16.mxu1 %v3008_v0 }
 0xddb   :  { %2834 = vmatprep.subr.bf16.mxu0 %v3008_v0 }
 0xddd   :  { %2833 = vmatpush3.bf16.msra.mxu1 %v3146_v37 }
 0xdde   :  { %2840 = vmatprep.subr.bf16.mxu1 %v3008_v0 }
 0xea3   :  { %v1326_v40 = vpop.f32.mrb[12].mxu1 }
 0xea4   :  { %v2615_v41 = vpop.f32.mrb[13].mxu1 }
 0xea8   :  { %v1401_v42 = vpop.f32.mrb[14].mxu0 }
 0xea9   :  { %v1402_v43 = vadd.f32 %v1401_v42, %v1326_v40  ;;  %v2626_v44 = vpop.f32.mrb[15].mxu0 }
 0xeab   :  { %v1405_v47 = vadd.f32 %v3185_v46, %v1402_v43  ;;  %v1498_v48 = vpop.f32.mrb[14].mxu1 }
 0xeac   :  { %v1502_v49 = vadd.f32 %v2328_v45, %v1498_v48  ;;  %v2637_v50 = vpop.f32.mrb[15].mxu1 }
 0xead   :  { %2948 = vtanh.f32 %v1405_v47  ;;  %v1406_v53 = vsub.f32 0.0, %v1405_v47 }
 0xeae   :  { %2950 = vtanh.f32 %v1502_v49  ;;  %v1503_v54 = vsub.f32 0.0, %v1502_v49 }
 0xeaf   :  { %v1407_v55 = vmul.f32 1.442695, %v1406_v53 }
 0xeb0   :  { %v1504_v56 = vmul.f32 1.442695, %v1503_v54 }
 0xeb1   :  { %2952 = vpow2.f32 %v1407_v55 }
 0xeb2   :  { %2954 = vpow2.f32 %v1504_v56 }
 0xeb7   :  { %v2949_v51 = vpop.eup %2948 }
 0xeb8   :  { %v2951_v52 = vpop.eup %2950  ;;  %1415 = vrot.lane.b32.xlu0 %v2949_v51, %s3011_s24 }
 0xeb9   :  { %1512 = vrot.lane.b32.xlu1 %v2951_v52, %s3011_s24 }
 0xebb   :  { %v2953_v57 = vpop.eup %2952 }
 0xebc   :  { %v2955_v58 = vpop.eup %2954  ;;  %v1409_v59 = vadd.f32 1.0, %v2953_v57 }
 0xebd   :  { %v1506_v60 = vadd.f32 1.0, %v2955_v58 }
 0xebe   :  { %2956 = vrcp.f32 %v1409_v59 }
 0xebf   :  { %2958 = vrcp.f32 %v1506_v60 }
 0xec8   :  { %v2957_v61 = vpop.eup %2956 }
 0xec9   :  { %v2959_v63 = vpop.eup %2958  ;;  %v1413_v6 = vmul.f32 %v2957_v61, %v3319_v24 }
 0xeca   :  { %v1510_v8 = vmul.f32 %v2959_v63, %v3323_v27  ;;  %v2332_v27 = vld [vmem:[%s3470_s0 + $0x18] sm:$0xf] }
 0xf2a   :  { %v1416_v62 = vpop.permute.xlu0 %1415 }
 0xf2b   :  { %v1513_v1 = vpop.permute.xlu1 %1512  ;;  %v1418_v2 = vmul.f32 %v2957_v61, %v1416_v62 }
 0xf2c   :  { %v1515_v3 = vmul.f32 %v2959_v63, %v1513_v1 }
 0xf2d   :  { %1420 = vrot.lane.b32.xlu0 %v1418_v2, %s3012_s27 }
 0xf2e   :  { %1517 = vrot.lane.b32.xlu1 %v1515_v3, %s3012_s27 }
 0xf9f   :  { %v1421_v9 = vpop.permute.xlu0 %1420 }
 0xfa0   :  { %v1518_v10 = vpop.permute.xlu1 %1517  ;;  %v3361_v11 = vadd.f32 %v1421_v9, %v1413_v6 }
 0xfa1   :  { %v3363_v12 = vadd.f32 %v1518_v10, %v1510_v8  ;;  %v2336_v8 = vld [vmem:[%s3470_s0 + $0x1c] sm:$0xf] }
 0xfa2   :  { %2960 = vtanh.f32 %v3361_v11 }
 0xfa3   :  { %2962 = vtanh.f32 %v3363_v12 }
 0xfac   :  { %v2961_v13 = vpop.eup %2960 }
 0xfad   :  { %v2963_v14 = vpop.eup %2962  ;;  %1426 = vrot.lane.b32.xlu0 %v2961_v13, %s3011_s24 }
 0xfae   :  { %1523 = vrot.lane.b32.xlu1 %v2963_v14, %s3011_s24 }
0x101f   :  { %v1427_v15 = vpop.permute.xlu0 %1426 }
0x1020   :  { %v1524_v16 = vpop.permute.xlu1 %1523  ;;  %v1429_v17 = vmul.f32 %v2957_v61, %v1427_v15 }
0x1021   :  { %v1526_v18 = vmul.f32 %v2959_v63, %v1524_v16 }
0x1022   :  { %1528 = vrot.lane.b32.xlu0 %v1429_v17, %s3012_s27 }
0x1023   :  { %1603 = vrot.lane.b32.xlu1 %v1526_v18, %s3012_s27 }
0x1094   :  { %v1529_v19 = vpop.permute.xlu0 %1528 }
0x1095   :  { %v1604_v20 = vpop.permute.xlu1 %1603  ;;  %2647 = vmatmul.mubr.msk.f32.vlgmr.msra.gmra.mrb[16].mxu0 %vm62_vm1, %v1529_v19 }
0x1096   :  { %2658 = vmatmul.mubr.msk.f32.vlgmr.msra.gmra.mrb[16].mxu1 %vm62_vm1, %v1604_v20  ;;  %2836 = vmatpush3.bf16.msra.mxu0 %v3081_v5 }
0x1097   :  { %2837 = vmatprep.subr.bf16.mxu0 %v3008_v0  ;;  %2668 = vmatprep.mubr.msk.f32.mxu0 %vm3009_vm0, %v3010_v4 }
0x1098   :  { %2842 = vmatpush3.bf16.msra.mxu1 %v3122_v29  ;;  %2679 = vmatprep.mubr.msk.f32.mxu1 %vm3009_vm0, %v3010_v4 }
0x1099   :  { %2843 = vmatprep.subr.bf16.mxu1 %v3008_v0 }
0x109a   :  { %2839 = vmatpush3.bf16.msra.mxu0 %v3090_v7 }
0x109b   :  { %2846 = vmatprep.subr.bf16.mxu0 %v3008_v0 }
0x109c   :  { %2845 = vmatpush3.bf16.msra.mxu1 %v3142_v36 }
0x109d   :  { %2669 = vmatmul.mubr.msk.f32.vlgmr.msra.gmra.mrb[18].mxu0 %vm62_vm1, %v1604_v20  ;;  %2852 = vmatprep.subr.bf16.mxu1 %v3008_v0 }
0x109e   :  { %2848 = vmatpush3.bf16.msra.mxu0 %v3133_v33  ;;  %2690 = vmatprep.mubr.msk.f32.mxu0 %vm3009_vm0, %v3010_v4 }
0x109f   :  { %2849 = vmatprep.subr.bf16.mxu0 %v3008_v0 }
0x10a2   :  { %2851 = vmatpush3.bf16.msra.mxu0 %v3146_v37 }
0x10a3   :  { %2858 = vmatprep.subr.bf16.mxu0 %v3008_v0 }
0x1168   :  { %v1598_v21 = vpop.f32.mrb[16].mxu0 }
0x1169   :  { %v1673_v22 = vpop.f32.mrb[16].mxu1  ;;  %v2648_v23 = vpop.f32.mrb[17].mxu0 }
0x116a   :  { %v1674_v24 = vadd.f32 %v1673_v22, %v1598_v21  ;;  %v2659_v25 = vpop.f32.mrb[17].mxu1 }
0x116c   :  { %v1677_v26 = vadd.f32 %v3185_v46, %v1674_v24 }
0x116e   :  { %2964 = vtanh.f32 %v1677_v26  ;;  %v1678_v35 = vsub.f32 0.0, %v1677_v26 }
0x1170   :  { %v1770_v28 = vpop.f32.mrb[18].mxu0  ;;  %v1679_v38 = vmul.f32 1.442695, %v1678_v35 }
0x1171   :  { %v1774_v30 = vadd.f32 %v2332_v27, %v1770_v28  ;;  %v2670_v31 = vpop.f32.mrb[19].mxu0 }
0x1173   :  { %2966 = vtanh.f32 %v1774_v30  ;;  %v1775_v39 = vsub.f32 0.0, %v1774_v30 }
0x1174   :  { %2968 = vpow2.f32 %v1679_v38 }
0x1175   :  { %v1776_v40 = vmul.f32 1.442695, %v1775_v39 }
0x1177   :  { %2970 = vpow2.f32 %v1776_v40 }
0x1178   :  { %v2965_v32 = vpop.eup %2964 }
0x1179   :  { %1687 = vrot.lane.b32.xlu0 %v2965_v32, %s3011_s24 }
0x117d   :  { %v2967_v34 = vpop.eup %2966 }
0x117e   :  { %1784 = vrot.lane.b32.xlu1 %v2967_v34, %s3011_s24  ;;  %v2969_v41 = vpop.eup %2968 }
0x117f   :  { %v1681_v42 = vadd.f32 1.0, %v2969_v41 }
0x1181   :  { %v2971_v43 = vpop.eup %2970  ;;  %2972 = vrcp.f32 %v1681_v42 }
0x1182   :  { %v1778_v44 = vadd.f32 1.0, %v2971_v43 }
0x1184   :  { %2974 = vrcp.f32 %v1778_v44 }
0x118b   :  { %v2973_v45 = vpop.eup %2972 }
0x118c   :  { %v1685_v52 = vmul.f32 %v2973_v45, %v3361_v11 }
0x118e   :  { %v2975_v49 = vpop.eup %2974 }
0x118f   :  { %v1782_v55 = vmul.f32 %v2975_v49, %v3363_v12 }
0x11eb   :  { %v1688_v47 = vpop.permute.xlu0 %1687 }
0x11ec   :  { %v1690_v48 = vmul.f32 %v2973_v45, %v1688_v47 }
0x11ee   :  { %1692 = vrot.lane.b32.xlu0 %v1690_v48, %s3012_s27 }
0x11f0   :  { %v1785_v50 = vpop.permute.xlu1 %1784 }
0x11f1   :  { %v1787_v51 = vmul.f32 %v2975_v49, %v1785_v50 }
0x11f3   :  { %1789 = vrot.lane.b32.xlu1 %v1787_v51, %s3012_s27 }
0x1260   :  { %v1693_v53 = vpop.permute.xlu0 %1692 }
0x1261   :  { %v3401_v54 = vadd.f32 %v1693_v53, %v1685_v52 }
0x1263   :  { %2976 = vtanh.f32 %v3401_v54 }
0x1265   :  { %v1790_v56 = vpop.permute.xlu1 %1789 }
0x1266   :  { %v3405_v57 = vadd.f32 %v1790_v56, %v1782_v55 }
0x1268   :  { %2978 = vtanh.f32 %v3405_v57 }
0x126d   :  { %v2977_v58 = vpop.eup %2976 }
0x126e   :  { %1698 = vrot.lane.b32.xlu0 %v2977_v58, %s3011_s24 }
0x1272   :  { %v2979_v59 = vpop.eup %2978 }
0x1273   :  { %1795 = vrot.lane.b32.xlu1 %v2979_v59, %s3011_s24 }
0x12e0   :  { %v1699_v60 = vpop.permute.xlu0 %1698 }
0x12e1   :  { %v1701_v61 = vmul.f32 %v2973_v45, %v1699_v60 }
0x12e3   :  { %1800 = vrot.lane.b32.xlu0 %v1701_v61, %s3012_s27 }
0x12e5   :  { %v1796_v62 = vpop.permute.xlu1 %1795 }
0x12e6   :  { %v1798_v63 = vmul.f32 %v2975_v49, %v1796_v62 }
0x12e8   :  { %1875 = vrot.lane.b32.xlu1 %v1798_v63, %s3012_s27 }
0x1355   :  { %v1801_v1 = vpop.permute.xlu0 %1800 }
0x1356   :  { %2680 = vmatmul.mubr.msk.f32.vlgmr.msra.gmra.mrb[18].mxu1 %vm62_vm1, %v1801_v1 }
0x1357   :  { %2854 = vmatpush3.bf16.msra.mxu1 %v3081_v5  ;;  %2701 = vmatprep.mubr.msk.f32.mxu1 %vm3009_vm0, %v3010_v4 }
0x1358   :  { %2855 = vmatprep.subr.bf16.mxu1 %v3008_v0 }
0x135a   :  { %v1876_v2 = vpop.permute.xlu1 %1875 }
0x135b   :  { %2857 = vmatpush3.bf16.msra.mxu1 %v3090_v7  ;;  %2691 = vmatmul.mubr.msk.f32.vlgmr.msra.gmra.mrb[20].mxu0 %vm62_vm1, %v1876_v2 }
0x135c   :  { %2864 = vmatprep.subr.bf16.mxu1 %v3008_v0  ;;  %2860 = vmatpush3.bf16.msra.mxu0 %v3122_v29 }
0x135d   :  { %2861 = vmatprep.subr.bf16.mxu0 %v3008_v0  ;;  %2712 = vmatprep.mubr.msk.f32.mxu0 %vm3009_vm0, %v3010_v4 }
0x135e   :  { %2702 = vmatmul.mubr.msk.f32.vlgmr.msra.gmra.mrb[20].mxu1 %vm62_vm1, %v1876_v2  ;;  %v16_v2 = vstv %s3476_s6 }
0x135f   :  { %2866 = vmatpush3.bf16.msra.mxu1 %v3133_v33  ;;  %2723 = vmatprep.mubr.msk.f32.mxu1 %vm3009_vm0, %v3010_v4  ;;  %17 = vst [vmem:[#allocation2] sm:$0x1] %v16_v2 }
0x1360   :  { %2867 = vmatprep.subr.bf16.mxu1 %v3008_v0  ;;  %2863 = vmatpush3.bf16.msra.mxu0 %v3142_v36 }
0x1363   :  { %2869 = vmatpush3.bf16.msra.mxu1 %v3146_v37 }
0x1429   :  { %v1870_v5 = vpop.f32.mrb[18].mxu1 }
0x142a   :  { %v2681_v7 = vpop.f32.mrb[19].mxu1 }
0x142e   :  { %v1945_v29 = vpop.f32.mrb[20].mxu0 }
0x142f   :  { %v1946_v3 = vadd.f32 %v1945_v29, %v1870_v5  ;;  %v2692_v6 = vpop.f32.mrb[21].mxu0 }
0x1431   :  { %v1949_v33 = vadd.f32 %v3185_v46, %v1946_v3  ;;  %v2042_v9 = vpop.f32.mrb[20].mxu1 }
0x1432   :  { %v2046_v10 = vadd.f32 %v2336_v8, %v2042_v9  ;;  %v2703_v4 = vpop.f32.mrb[21].mxu1 }
0x1433   :  { %2980 = vtanh.f32 %v1949_v33  ;;  %v1950_v37 = vsub.f32 0.0, %v1949_v33 }
0x1434   :  { %2982 = vtanh.f32 %v2046_v10  ;;  %v2047_v11 = vsub.f32 0.0, %v2046_v10  ;;  %v2341_v10 = vld [vmem:[#allocation2] ss:$0 sm:$0xff] }
0x1435   :  { %v1951_v12 = vmul.f32 1.442695, %v1950_v37 }
0x1436   :  { %v2048_v13 = vmul.f32 1.442695, %v2047_v11 }
0x1437   :  { %2984 = vpow2.f32 %v1951_v12 }
0x1438   :  { %2986 = vpow2.f32 %v2048_v13 }
0x143d   :  { %v2981_v0 = vpop.eup %2980 }
0x143e   :  { %v2983_v36 = vpop.eup %2982  ;;  %1959 = vrot.lane.b32.xlu0 %v2981_v0, %s3011_s24 }
0x143f   :  { %2056 = vrot.lane.b32.xlu1 %v2983_v36, %s3011_s24 }
0x1441   :  { %v2985_v14 = vpop.eup %2984 }
0x1442   :  { %v2987_v15 = vpop.eup %2986  ;;  %v1953_v16 = vadd.f32 1.0, %v2985_v14 }
0x1443   :  { %v2050_v17 = vadd.f32 1.0, %v2987_v15 }
0x1444   :  { %2988 = vrcp.f32 %v1953_v16 }
0x1445   :  { %2990 = vrcp.f32 %v2050_v17 }
0x144e   :  { %v2989_v18 = vpop.eup %2988 }
0x144f   :  { %v2991_v20 = vpop.eup %2990  ;;  %v1957_v24 = vmul.f32 %v2989_v18, %v3401_v54 }
0x1450   :  { %v2054_v25 = vmul.f32 %v2991_v20, %v3405_v57  ;;  %v2340_v57 = vld [vmem:[%s3475_s5] ss:$0 sm:$0xff] }
0x14b0   :  { %v1960_v19 = vpop.permute.xlu0 %1959 }
0x14b1   :  { %v2057_v21 = vpop.permute.xlu1 %2056  ;;  %v1962_v22 = vmul.f32 %v2989_v18, %v1960_v19 }
0x14b2   :  { %v2059_v23 = vmul.f32 %v2991_v20, %v2057_v21 }
0x14b3   :  { %1964 = vrot.lane.b32.xlu0 %v1962_v22, %s3012_s27 }
0x14b4   :  { %2061 = vrot.lane.b32.xlu1 %v2059_v23, %s3012_s27 }
0x1525   :  { %v1965_v26 = vpop.permute.xlu0 %1964 }
0x1526   :  { %v2062_v27 = vpop.permute.xlu1 %2061  ;;  %v1967_v28 = vadd.f32 %v1965_v26, %v1957_v24 }
0x1527   :  { %v2064_v30 = vadd.f32 %v2062_v27, %v2054_v25 }
0x1528   :  { %2992 = vtanh.f32 %v1967_v28 }
0x1529   :  { %2994 = vtanh.f32 %v2064_v30 }
0x1532   :  { %v2993_v31 = vpop.eup %2992 }
0x1533   :  { %v2995_v32 = vpop.eup %2994  ;;  %1970 = vrot.lane.b32.xlu0 %v2993_v31, %s3011_s24 }
0x1534   :  { %2067 = vrot.lane.b32.xlu1 %v2995_v32, %s3011_s24 }
0x15a5   :  { %v1971_v34 = vpop.permute.xlu0 %1970 }
0x15a6   :  { %v2068_v35 = vpop.permute.xlu1 %2067  ;;  %v1973_v38 = vmul.f32 %v2989_v18, %v1971_v34 }
0x15a7   :  { %v2070_v39 = vmul.f32 %v2991_v20, %v2068_v35 }
0x15a8   :  { %2072 = vrot.lane.b32.xlu0 %v1973_v38, %s3012_s27 }
0x15a9   :  { %2147 = vrot.lane.b32.xlu1 %v2070_v39, %s3012_s27 }
0x161a   :  { %v2073_v40 = vpop.permute.xlu0 %2072 }
0x161b   :  { %v2148_v41 = vpop.permute.xlu1 %2147  ;;  %2713 = vmatmul.mubr.msk.f32.vlgmr.msra.gmra.mrb[22].mxu0 %vm62_vm1, %v2073_v40 }
0x161c   :  { %2724 = vmatmul.mubr.msk.f32.vlgmr.msra.gmra.mrb[22].mxu1 %vm62_vm1, %v2148_v41 }
0x16ee   :  { %v2142_v42 = vpop.f32.mrb[22].mxu0 }
0x16ef   :  { %v2217_v43 = vpop.f32.mrb[22].mxu1  ;;  %v2714_v44 = vpop.f32.mrb[23].mxu0 }
0x16f0   :  { %v2218_v45 = vadd.f32 %v2217_v43, %v2142_v42  ;;  %v2725_v47 = vpop.f32.mrb[23].mxu1 }
0x16f2   :  { %v2221_v48 = vadd.f32 %v3185_v46, %v2218_v45 }
0x16f4   :  { %2996 = vtanh.f32 %v2221_v48  ;;  %v2222_v50 = vsub.f32 0.0, %v2221_v48 }
0x16f6   :  { %v2223_v51 = vmul.f32 1.442695, %v2222_v50 }
0x16f8   :  { %2998 = vpow2.f32 %v2223_v51 }
0x16fe   :  { %v2997_v49 = vpop.eup %2996 }
0x16ff   :  { %2231 = vrot.lane.b32.xlu0 %v2997_v49, %s3011_s24 }
0x1702   :  { %v2999_v52 = vpop.eup %2998 }
0x1703   :  { %v2225_v53 = vadd.f32 1.0, %v2999_v52 }
0x1705   :  { %3000 = vrcp.f32 %v2225_v53 }
0x170f   :  { %v3001_v54 = vpop.eup %3000 }
0x1710   :  { %v2229_v46 = vmul.f32 %v3001_v54, %v1967_v28 }
0x1771   :  { %v2232_v55 = vpop.permute.xlu0 %2231 }
0x1772   :  { %v2234_v56 = vmul.f32 %v3001_v54, %v2232_v55 }
0x1774   :  { %2236 = vrot.lane.b32.xlu1 %v2234_v56, %s3012_s27 }
0x1778   :  { %2252 = vrot.lane.b32.xlu1 %v2340_v57, %s3013_s21 }
0x17e6   :  { %v2237_v58 = vpop.permute.xlu1 %2236 }
0x17e7   :  { %v2239_v59 = vadd.f32 %v2237_v58, %v2229_v46 }
0x17e9   :  { %3002 = vtanh.f32 %v2239_v59 }
0x17ea   :  { %v2253_v62 = vpop.permute.xlu1 %2252 }
0x17f3   :  { %v3003_v60 = vpop.eup %3002 }
0x17f4   :  { %2242 = vrot.lane.b32.xlu0 %v3003_v60, %s3011_s24 }
0x1866   :  { %v2243_v61 = vpop.permute.xlu0 %2242 }
0x1867   :  { %v2245_v63 = vmul.f32 %v3001_v54, %v2243_v61 }
0x1869   :  { %v2255_v1 = vmul.f32 %v2253_v62, %v2245_v63 }
0x186b   :  { %2257 = vrot.lane.b32.xlu0 %v2255_v1, %s3012_s27 }
0x186f   :  { %2281 = vrot.lane.b32.xlu0 %v2245_v63, %s3011_s24 }
0x1873   :  { %2285 = vrot.lane.b32.xlu0 %v2064_v30, %s3012_s27 }
0x1877   :  { %2289 = vrot.lane.b32.xlu0 %v2239_v59, %s3011_s24 }
0x18dd   :  { %v2258_v5 = vpop.permute.xlu0 %2257 }
0x18de   :  { %v2261_v7 = vsel %vm2260_vm2, %v2258_v5, 0.0 }
0x18df   :  { %2262 = vadd.xlane.f32.xlu1 %v2261_v7 }
0x18e1   :  { %v2282_v29 = vpop.permute.xlu0 %2281 }
0x18e2   :  { %v2292_v6 = vsel %vm62_vm1, %v2148_v41, %v2282_v29 }
0x18e5   :  { %v2286_v3 = vpop.permute.xlu0 %2285 }
0x18e6   :  { %v2294_v8 = vsel %vm2293_vm3, %v2292_v6, %v2286_v3 }
0x18e9   :  { %v2290_v33 = vpop.permute.xlu0 %2289 }
0x18ea   :  { %v2296_v9 = vsel %vm2295_vm4, %v2294_v8, %v2290_v33 }
0x18eb   :  { %2297 = vst [vmem:[%s3477_s10] sm:$0xf] %v2296_v9 }
0x196c   :  { %v2263_v4 = vpop.xlane.xlu1 %2262 }
0x196d   :  { %v2271_v0 = vadd.f32 %v2341_v10, %v2263_v4 }
0x196f   :  { %v2272_v36 = vsub.f32 0.0, %v2271_v0 }
0x1971   :  { %v2273_v37 = vmul.f32 1.442695, %v2272_v36 }
0x1973   :  { %3004 = vpow2.f32 %v2273_v37 }
0x197d   :  { %v3005_v11 = vpop.eup %3004 }
0x197e   :  { %v2275_v12 = vadd.f32 1.0, %v3005_v11 }
0x1980   :  { %3006 = vrcp.f32 %v2275_v12 }
0x198a   :  { %v3007_v13 = vpop.eup %3006 }
0x198b   :  { %2278 = vst.msk [vmem:[%s3478_s9] sm:$0xf] %vm2277_vm5, %v3007_v13 }

</bundles_post_ra>
